<compile_context>
chip_gen: v7x
topology: tpu7x:2x2x1
jax: 0.10.0
libtpu: 0.0.40
codegen_flags: <defaults>
</compile_context>

<pallas_src>
import functools

import jax
import jax.numpy as jnp
from jax import lax
from jax.experimental import pallas as pl
from jax.experimental.pallas import tpu as pltpu

BN_EPS = 1e-5
D_EMB = 512            # per-sentence embedding width
SEQ_IN = D_EMB * 3     # 1536
FC_DIM = 600
FC_DIM2 = FC_DIM // 2  # 300
OUT_DIM = 1

H1_PAD = 640           # 5 * 128  (600 padded)
H2_PAD = 384           # 3 * 128  (300 padded)

DEFAULT_COMPUTE_DTYPE = jnp.bfloat16   # MXU fast path; accumulation stays f32.


def _round_up(x, m):
    return (x + m - 1) // m * m


def _sublane(dtype):
    """Minimum second-to-last tile dim for this MXU-operand dtype."""
    return 16 if jnp.dtype(dtype) == jnp.dtype(jnp.bfloat16) else 8


# -----------------------------------------------------------------------------
# Kernel
# -----------------------------------------------------------------------------
def _mlp_kernel(en_ref, de_ref,
                w1a_ref, w1b_ref, w1c_ref, b1_ref,
                w2_ref, b2_ref,
                w3_ref, b3_ref,
                o_ref):
    en = en_ref[...]
    de = de_ref[...]
    diff = jnp.abs(en - de)

    # Layer 1: split-K accumulation replaces concat([en, de, |en-de|]) @ W1.
    h1 = jnp.dot(en, w1a_ref[...], preferred_element_type=jnp.float32)
    h1 = h1 + jnp.dot(de, w1b_ref[...], preferred_element_type=jnp.float32)
    h1 = h1 + jnp.dot(diff, w1c_ref[...], preferred_element_type=jnp.float32)
    h1 = h1 + b1_ref[...]
    h1 = jnp.where(h1 >= 0.0, h1, 0.01 * h1)          # LeakyReLU(0.01)
    # (BatchNorm1d #1 folded into W2 / b2.)

    # Layer 2
    h2 = jnp.dot(h1.astype(w2_ref.dtype), w2_ref[...],
                 preferred_element_type=jnp.float32) + b2_ref[...]
    h2 = jnp.maximum(h2, 0.0)                          # ReLU
    # (BatchNorm1d #2 folded into W3 / b3.)

    # Layer 3: N=1 output -> VPU multiply + lane reduce, keeps the MXU free.
    out = jnp.sum(h2 * w3_ref[...], axis=-1, keepdims=True) + b3_ref[...]
    o_ref[...] = out.astype(o_ref.dtype)


# -----------------------------------------------------------------------------
# Parameter folding / padding (done ONCE, at load time, outside fc_classifier)
# -----------------------------------------------------------------------------
def prepare_params(params, compute_dtype=DEFAULT_COMPUTE_DTYPE):
    """Fold eval-mode BNs into the following Linear, split W1, pad to lane widths.

    Call this once when loading weights; pass the returned tuple to
    fc_classifier.  (Hoisted out of the per-call jit per perf review.)
    """
    (w1, b1, g1, bt1, rm1, rv1,
     w2, b2, g2, bt2, rm2, rv2,
     w3, b3) = params

    # BN1 -> (scale, shift), folded into Linear2.
    s1 = g1 * lax.rsqrt(rv1 + BN_EPS)                  # (1, 600)
    sh1 = bt1 - rm1 * s1
    w2f = s1.reshape(-1, 1) * w2                       # (600, 300)
    b2f = sh1 @ w2 + b2                                # (1, 300)

    # BN2 -> folded into Linear3.
    s2 = g2 * lax.rsqrt(rv2 + BN_EPS)                  # (1, 300)
    sh2 = bt2 - rm2 * s2
    w3f = s2.reshape(-1, 1) * w3                       # (300, 1)
    b3f = sh2 @ w3 + b3                                # (1, 1)

    # Split W1 by feature block (en / de / |en-de|).
    w1a, w1b, w1c = w1[:D_EMB], w1[D_EMB:2 * D_EMB], w1[2 * D_EMB:]

    def pad_cols(x, n):
        return jnp.pad(x, ((0, 0), (0, n - x.shape[1])))

    w1a = pad_cols(w1a, H1_PAD).astype(compute_dtype)
    w1b = pad_cols(w1b, H1_PAD).astype(compute_dtype)
    w1c = pad_cols(w1c, H1_PAD).astype(compute_dtype)
    b1p = pad_cols(b1, H1_PAD).astype(jnp.float32)

    w2p = jnp.pad(w2f, ((0, H1_PAD - FC_DIM), (0, H2_PAD - FC_DIM2))
                  ).astype(compute_dtype)
    b2p = pad_cols(b2f, H2_PAD).astype(jnp.float32)

    w3row = pad_cols(w3f.T, H2_PAD).astype(jnp.float32)   # (1, 384)
    b3p = b3f.astype(jnp.float32)                          # (1, 1)

    return (w1a, w1b, w1c, b1p, w2p, b2p, w3row, b3p)


# -----------------------------------------------------------------------------
# Wrapper
# -----------------------------------------------------------------------------
@functools.partial(jax.jit, static_argnames=("block_b",))
def fc_classifier(en, de, folded_params, *, block_b=1024):
    """Run the classifier.  `folded_params` comes from prepare_params()."""
    (w1a, w1b, w1c, b1p, w2p, b2p, w3row, b3p) = folded_params
    compute_dtype = w1a.dtype
    sub = _sublane(compute_dtype)
    B = en.shape[0]

    # Batch tile: large enough to amortize the ~0.35us/step overhead, but
    # capped at ceil(B/2) (rounded to the sublane multiple) so the grid has
    # >= 2 steps whenever B allows -> both v7x TensorCores get work.
    half = _round_up(max((B + 1) // 2, sub), sub)
    tb = _round_up(min(block_b, half), sub)
    bp = _round_up(B, tb)
    if bp != B:
        pad = ((0, bp - B), (0, 0))
        en = jnp.pad(en, pad)
        de = jnp.pad(de, pad)
    en = en.astype(compute_dtype)
    de = de.astype(compute_dtype)

    grid = (bp // tb,)

    act_spec = pl.BlockSpec((tb, D_EMB), lambda i: (i, 0))
    const = lambda shape: pl.BlockSpec(shape, lambda i: (0, 0))   # resident weights

    in_specs = [
        act_spec, act_spec,                            # en, de
        const((D_EMB, H1_PAD)), const((D_EMB, H1_PAD)), const((D_EMB, H1_PAD)),
        const((1, H1_PAD)),                            # b1
        const((H1_PAD, H2_PAD)), const((1, H2_PAD)),   # w2, b2
        const((1, H2_PAD)), const((1, 1)),             # w3 row, b3
    ]
    out_spec = pl.BlockSpec((tb, OUT_DIM), lambda i: (i, 0))

    # Right-size the VMEM limit from actual buffer sizes (Pallas allocates two
    # buffers per operand even with a constant index_map) plus headroom for
    # Mosaic internal scratch.  Keeps comfortable margin on v7x (64 MiB/TC).
    wdt = jnp.dtype(compute_dtype).itemsize
    weight_bytes = ((3 * D_EMB * H1_PAD + H1_PAD * H2_PAD) * wdt
                    + (H1_PAD + 2 * H2_PAD + 1) * 4)           # + f32 biases/head
    act_bytes = 2 * tb * D_EMB * wdt                            # en + de, one buffer
    out_bytes = tb * OUT_DIM * 4
    vmem_limit = int(2 * (weight_bytes + act_bytes + out_bytes) + (8 << 20))

    cost = pl.CostEstimate(
        flops=2 * bp * (SEQ_IN * FC_DIM + FC_DIM * FC_DIM2 + FC_DIM2),
        transcendentals=0,
        bytes_accessed=(2 * bp * D_EMB * wdt + weight_bytes + bp * OUT_DIM * 4),
    )

    out = pl.pallas_call(
        _mlp_kernel,
        out_shape=jax.ShapeDtypeStruct((bp, OUT_DIM), jnp.float32),
        grid=grid,
        in_specs=in_specs,
        out_specs=out_spec,
        compiler_params=pltpu.CompilerParams(
            dimension_semantics=("parallel",),
            vmem_limit_bytes=vmem_limit,
        ),
        cost_estimate=cost,
    )(en, de, w1a, w1b, w1c, b1p, w2p, b2p, w3row, b3p)

    return out[:B]


# -----------------------------------------------------------------------------
# Parameter init + pure-JAX reference (unfolded, for sanity checking)
# -----------------------------------------------------------------------------
def init_params(key):
    """PyTorch-style init: Linear U(-1/sqrt(fan_in), 1/sqrt(fan_in)); BN defaults."""
    def linear(k, fan_in, fan_out):
        k_w, k_b = jax.random.split(k)
        bound = 1.0 / (fan_in ** 0.5)
        w = jax.random.uniform(k_w, (fan_in, fan_out), jnp.float32, -bound, bound)
        b = jax.random.uniform(k_b, (1, fan_out), jnp.float32, -bound, bound)
        return w, b

    k1, k2, k3 = jax.random.split(key, 3)
    w1, b1 = linear(k1, SEQ_IN, FC_DIM)
    w2, b2 = linear(k2, FC_DIM, FC_DIM2)
    w3, b3 = linear(k3, FC_DIM2, OUT_DIM)

    def bn(dim):
        return (jnp.ones((1, dim), jnp.float32),    # gamma
                jnp.zeros((1, dim), jnp.float32),   # beta
                jnp.zeros((1, dim), jnp.float32),   # running_mean
                jnp.ones((1, dim), jnp.float32))    # running_var

    g1, bt1, rm1, rv1 = bn(FC_DIM)
    g2, bt2, rm2, rv2 = bn(FC_DIM2)

    return (w1, b1, g1, bt1, rm1, rv1,
            w2, b2, g2, bt2, rm2, rv2,
            w3, b3)


def reference(en, de, params):
    (w1, b1, g1, bt1, rm1, rv1,
     w2, b2, g2, bt2, rm2, rv2,
     w3, b3) = params
    feats = jnp.concatenate([en, de, jnp.abs(en - de)], axis=1)
    h = feats @ w1 + b1
    h = jnp.where(h >= 0.0, h, 0.01 * h)
    h = (h - rm1) / jnp.sqrt(rv1 + BN_EPS) * g1 + bt1
    h = h @ w2 + b2
    h = jnp.maximum(h, 0.0)
    h = (h - rm2) / jnp.sqrt(rv2 + BN_EPS) * g2 + bt2
    return h @ w3 + b3


if __name__ == "__main__":
    key = jax.random.PRNGKey(0)
    k_en, k_de, k_p = jax.random.split(key, 3)

    B = 8
    en = jax.random.normal(k_en, (B, D_EMB), jnp.float32)
    de = jax.random.normal(k_de, (B, D_EMB), jnp.float32)
    params = init_params(k_p)

    ref = reference(en, de, params)

    # Default fast path: bf16 MXU operands, f32 accumulation.  Folding/padding
    # done ONCE here (load time), not inside the per-call jit.
    folded_bf16 = prepare_params(params)
    out = jax.block_until_ready(fc_classifier(en, de, folded_bf16))
    assert out.shape == (B, OUT_DIM), out.shape
    assert jnp.allclose(out, ref, atol=5e-2, rtol=5e-2), "bf16 mismatch vs reference"

    # Exact f32 path (works on all generations).
    folded_f32 = prepare_params(params, compute_dtype=jnp.float32)
    out_f32 = jax.block_until_ready(fc_classifier(en, de, folded_f32))
    assert jnp.allclose(out_f32, ref, atol=1e-3, rtol=1e-3), "f32 mismatch vs reference"

    print("KERNEL_OK")
</pallas_src>

<mosaic_0001>
module attributes {stable_mosaic.version = 11 : i64} {
  func.func @_mlp_kernel(%arg0: i32, %arg1: memref<16x512xbf16, #tpu.memory_space<vmem>>, %arg2: memref<16x512xbf16, #tpu.memory_space<vmem>>, %arg3: memref<512x640xbf16, #tpu.memory_space<vmem>>, %arg4: memref<512x640xbf16, #tpu.memory_space<vmem>>, %arg5: memref<512x640xbf16, #tpu.memory_space<vmem>>, %arg6: memref<1x640xf32, #tpu.memory_space<vmem>>, %arg7: memref<640x384xbf16, #tpu.memory_space<vmem>>, %arg8: memref<1x384xf32, #tpu.memory_space<vmem>>, %arg9: memref<1x384xf32, #tpu.memory_space<vmem>>, %arg10: memref<1x1xf32, #tpu.memory_space<vmem>>, %arg11: memref<16x1xf32, #tpu.memory_space<vmem>>) attributes {dimension_semantics = [#tpu.dimension_semantics<parallel>], iteration_bounds = array<i64: 1>, scalar_prefetch = 0 : i64, scratch_operands = 0 : i64, tpu.core_type = #tpu.core_type<tc>, window_params = [{transform_indices = @transform_0, window_bounds = array<i64: 16, 512>}, {transform_indices = @transform_1, window_bounds = array<i64: 16, 512>}, {pipeline_mode = #tpu.pipeline_mode<synchronous>, transform_indices = @transform_2, window_bounds = array<i64: 512, 640>}, {pipeline_mode = #tpu.pipeline_mode<synchronous>, transform_indices = @transform_3, window_bounds = array<i64: 512, 640>}, {pipeline_mode = #tpu.pipeline_mode<synchronous>, transform_indices = @transform_4, window_bounds = array<i64: 512, 640>}, {pipeline_mode = #tpu.pipeline_mode<synchronous>, transform_indices = @transform_5, window_bounds = array<i64: 1, 640>}, {pipeline_mode = #tpu.pipeline_mode<synchronous>, transform_indices = @transform_6, window_bounds = array<i64: 640, 384>}, {pipeline_mode = #tpu.pipeline_mode<synchronous>, transform_indices = @transform_7, window_bounds = array<i64: 1, 384>}, {pipeline_mode = #tpu.pipeline_mode<synchronous>, transform_indices = @transform_8, window_bounds = array<i64: 1, 384>}, {pipeline_mode = #tpu.pipeline_mode<synchronous>, transform_indices = @transform_9, window_bounds = array<i64: 1, 1>}, {transform_indices = @transform_10, window_bounds = array<i64: 16, 1>}]} {
    %c0 = arith.constant 0 : index
    %c0_0 = arith.constant 0 : index
    %0 = vector.load %arg1[%c0, %c0_0] : memref<16x512xbf16, #tpu.memory_space<vmem>>, vector<16x512xbf16>
    %c0_1 = arith.constant 0 : index
    %c0_2 = arith.constant 0 : index
    %1 = vector.load %arg2[%c0_1, %c0_2] : memref<16x512xbf16, #tpu.memory_space<vmem>>, vector<16x512xbf16>
    %2 = arith.subf %0, %1 : vector<16x512xbf16>
    %3 = math.absf %2 : vector<16x512xbf16>
    %c0_3 = arith.constant 0 : index
    %c0_4 = arith.constant 0 : index
    %4 = vector.load %arg3[%c0_3, %c0_4] : memref<512x640xbf16, #tpu.memory_space<vmem>>, vector<512x640xbf16>
    %cst = arith.constant dense<0.000000e+00> : vector<16x640xf32>
    %5 = tpu.matmul %0, %4, %cst {dimension_numbers = #tpu.dot_dimension_numbers<[1], [0], [0], [1], [0, 0, 1, 1], [], []>} : vector<16x512xbf16>, vector<512x640xbf16>, vector<16x640xf32> -> vector<16x640xf32>
    %c0_5 = arith.constant 0 : index
    %c0_6 = arith.constant 0 : index
    %6 = vector.load %arg4[%c0_5, %c0_6] : memref<512x640xbf16, #tpu.memory_space<vmem>>, vector<512x640xbf16>
    %cst_7 = arith.constant dense<0.000000e+00> : vector<16x640xf32>
    %7 = tpu.matmul %1, %6, %cst_7 {dimension_numbers = #tpu.dot_dimension_numbers<[1], [0], [0], [1], [0, 0, 1, 1], [], []>} : vector<16x512xbf16>, vector<512x640xbf16>, vector<16x640xf32> -> vector<16x640xf32>
    %8 = arith.addf %5, %7 : vector<16x640xf32>
    %c0_8 = arith.constant 0 : index
    %c0_9 = arith.constant 0 : index
    %9 = vector.load %arg5[%c0_8, %c0_9] : memref<512x640xbf16, #tpu.memory_space<vmem>>, vector<512x640xbf16>
    %cst_10 = arith.constant dense<0.000000e+00> : vector<16x640xf32>
    %10 = tpu.matmul %3, %9, %cst_10 {dimension_numbers = #tpu.dot_dimension_numbers<[1], [0], [0], [1], [0, 0, 1, 1], [], []>} : vector<16x512xbf16>, vector<512x640xbf16>, vector<16x640xf32> -> vector<16x640xf32>
    %11 = arith.addf %8, %10 : vector<16x640xf32>
    %c0_11 = arith.constant 0 : index
    %c0_12 = arith.constant 0 : index
    %12 = vector.load %arg6[%c0_11, %c0_12] : memref<1x640xf32, #tpu.memory_space<vmem>>, vector<1x640xf32>
    %13 = vector.broadcast %12 : vector<1x640xf32> to vector<16x640xf32>
    %14 = arith.addf %11, %13 : vector<16x640xf32>
    %cst_13 = arith.constant 0.000000e+00 : f32
    %15 = vector.broadcast %cst_13 : f32 to vector<16x640xf32>
    %16 = arith.cmpf oge, %14, %15 : vector<16x640xf32>
    %cst_14 = arith.constant 0.00999999977 : f32
    %17 = vector.broadcast %cst_14 : f32 to vector<16x640xf32>
    %18 = arith.mulf %17, %14 : vector<16x640xf32>
    %19 = arith.select %16, %14, %18 : vector<16x640xi1>, vector<16x640xf32>
    %20 = arith.truncf %19 : vector<16x640xf32> to vector<16x640xbf16>
    %c0_15 = arith.constant 0 : index
    %c0_16 = arith.constant 0 : index
    %21 = vector.load %arg7[%c0_15, %c0_16] : memref<640x384xbf16, #tpu.memory_space<vmem>>, vector<640x384xbf16>
    %cst_17 = arith.constant dense<0.000000e+00> : vector<16x384xf32>
    %22 = tpu.matmul %20, %21, %cst_17 {dimension_numbers = #tpu.dot_dimension_numbers<[1], [0], [0], [1], [0, 0, 1, 1], [], []>} : vector<16x640xbf16>, vector<640x384xbf16>, vector<16x384xf32> -> vector<16x384xf32>
    %c0_18 = arith.constant 0 : index
    %c0_19 = arith.constant 0 : index
    %23 = vector.load %arg8[%c0_18, %c0_19] : memref<1x384xf32, #tpu.memory_space<vmem>>, vector<1x384xf32>
    %24 = vector.broadcast %23 : vector<1x384xf32> to vector<16x384xf32>
    %25 = arith.addf %22, %24 : vector<16x384xf32>
    %cst_20 = arith.constant 0.000000e+00 : f32
    %26 = vector.broadcast %cst_20 : f32 to vector<16x384xf32>
    %27 = arith.maximumf %25, %26 : vector<16x384xf32>
    %c0_21 = arith.constant 0 : index
    %c0_22 = arith.constant 0 : index
    %28 = vector.load %arg9[%c0_21, %c0_22] : memref<1x384xf32, #tpu.memory_space<vmem>>, vector<1x384xf32>
    %29 = vector.broadcast %28 : vector<1x384xf32> to vector<16x384xf32>
    %30 = arith.mulf %27, %29 : vector<16x384xf32>
    %cst_23 = arith.constant dense<0.000000e+00> : vector<16xf32>
    %31 = vector.multi_reduction <add>, %30, %cst_23 [1] : vector<16x384xf32> to vector<16xf32>
    %32 = vector.shape_cast %31 : vector<16xf32> to vector<16x1xf32>
    %c0_24 = arith.constant 0 : index
    %c0_25 = arith.constant 0 : index
    %33 = vector.load %arg10[%c0_24, %c0_25] : memref<1x1xf32, #tpu.memory_space<vmem>>, vector<1x1xf32>
    %34 = vector.broadcast %33 : vector<1x1xf32> to vector<16x1xf32>
    %35 = arith.addf %32, %34 : vector<16x1xf32>
    %c0_26 = arith.constant 0 : index
    %c0_27 = arith.constant 0 : index
    %36 = vector.load %arg11[%c0_26, %c0_27] : memref<16x1xf32, #tpu.memory_space<vmem>>, vector<16x1xf32>
    tpu.vector_store %arg11[%c0_26, %c0_27], %35 {strides = array<i32>} : memref<16x1xf32, #tpu.memory_space<vmem>>, vector<16x1xf32>,
    return
  }
  func.func @transform_0(%arg0: i32) -> (i32, i32) {
    %c0_i32 = arith.constant 0 : i32
    %c0_i32_0 = arith.constant 0 : i32
    return %arg0, %c0_i32 : i32, i32
  }
  func.func @transform_1(%arg0: i32) -> (i32, i32) {
    %c0_i32 = arith.constant 0 : i32
    %c0_i32_0 = arith.constant 0 : i32
    return %arg0, %c0_i32 : i32, i32
  }
  func.func @transform_2(%arg0: i32) -> (i32, i32) {
    %c0_i32 = arith.constant 0 : i32
    %c0_i32_0 = arith.constant 0 : i32
    %c0_i32_1 = arith.constant 0 : i32
    return %c0_i32, %c0_i32_0 : i32, i32
  }
  func.func @transform_3(%arg0: i32) -> (i32, i32) {
    %c0_i32 = arith.constant 0 : i32
    %c0_i32_0 = arith.constant 0 : i32
    %c0_i32_1 = arith.constant 0 : i32
    return %c0_i32, %c0_i32_0 : i32, i32
  }
  func.func @transform_4(%arg0: i32) -> (i32, i32) {
    %c0_i32 = arith.constant 0 : i32
    %c0_i32_0 = arith.constant 0 : i32
    %c0_i32_1 = arith.constant 0 : i32
    return %c0_i32, %c0_i32_0 : i32, i32
  }
  func.func @transform_5(%arg0: i32) -> (i32, i32) {
    %c0_i32 = arith.constant 0 : i32
    %c0_i32_0 = arith.constant 0 : i32
    %c0_i32_1 = arith.constant 0 : i32
    return %c0_i32, %c0_i32_0 : i32, i32
  }
  func.func @transform_6(%arg0: i32) -> (i32, i32) {
    %c0_i32 = arith.constant 0 : i32
    %c0_i32_0 = arith.constant 0 : i32
    %c0_i32_1 = arith.constant 0 : i32
    return %c0_i32, %c0_i32_0 : i32, i32
  }
  func.func @transform_7(%arg0: i32) -> (i32, i32) {
    %c0_i32 = arith.constant 0 : i32
    %c0_i32_0 = arith.constant 0 : i32
    %c0_i32_1 = arith.constant 0 : i32
    return %c0_i32, %c0_i32_0 : i32, i32
  }
  func.func @transform_8(%arg0: i32) -> (i32, i32) {
    %c0_i32 = arith.constant 0 : i32
    %c0_i32_0 = arith.constant 0 : i32
    %c0_i32_1 = arith.constant 0 : i32
    return %c0_i32, %c0_i32_0 : i32, i32
  }
  func.func @transform_9(%arg0: i32) -> (i32, i32) {
    %c0_i32 = arith.constant 0 : i32
    %c0_i32_0 = arith.constant 0 : i32
    %c0_i32_1 = arith.constant 0 : i32
    return %c0_i32, %c0_i32_0 : i32, i32
  }
  func.func @transform_10(%arg0: i32) -> (i32, i32) {
    %c0_i32 = arith.constant 0 : i32
    %c0_i32_0 = arith.constant 0 : i32
    return %arg0, %c0_i32 : i32, i32
  }
}

</mosaic_0001>

<bundles_post_ra>
// kernel: fc_classifier.1
= control target key start
LH: loop header
LB: loop body
LE: loop exit
PB: predicated region body
PF: predicated region fallthrough
CT: control target
= control target key end

     0   :  { %s7398_s0 = inlined_call_operand.vmem [shape: bf16[16,512], index: 0, kind: input, shape index: {}]   ;;  %s7399_s1 = inlined_call_operand.vmem [shape: bf16[16,512], index: 1, kind: input, shape index: {}]   ;;  %s7400_s2 = inlined_call_operand.hbm [shape: bf16[512,640], index: 2, kind: input, shape index: {}]   ;;  %s7401_s3 = inlined_call_operand.hbm [shape: bf16[512,640], index: 3, kind: input, shape index: {}]   ;;  %s7402_s4 = inlined_call_operand.hbm [shape: bf16[512,640], index: 4, kind: input, shape index: {}]   ;;  %s7403_s5 = inlined_call_operand.vmem [shape: f32[1,640], index: 5, kind: input, shape index: {}]   ;;  %s7404_s6 = inlined_call_operand.hbm [shape: bf16[640,384], index: 6, kind: input, shape index: {}]   ;;  %s7405_s7 = inlined_call_operand.vmem [shape: f32[1,384], index: 7, kind: input, shape index: {}]   ;;  %s7406_s8 = inlined_call_operand.vmem [shape: f32[1,384], index: 8, kind: input, shape index: {}]   ;;  %s7407_s9 = inlined_call_operand.<no memory space> [shape: f32[1,1], index: 9, kind: input, shape index: {}]   ;;  %s7408_s10 = inlined_call_operand.vmem [shape: f32[16,1], index: 10, kind: output, shape index: {}]  }
   0x1   :  { %v15_v0 = vstv %s7407_s9 }
   0x2   :  { %16 = vst [vmem:[#allocation2] sm:$0x1] %v15_v0 }
   0x3   :  { %17 = vsyncpa [#allocation4], 0 }
   0x4   :  { %18 = vsyncpa [#allocation6], 0 }
   0x5   :  { %19 = vsyncpa [#allocation9], 0  ;;  %s7033_s15 = smov [#allocation5]   ;;  %s7034_s17 = smov [#allocation3]  }
   0x6   :  { %s41_s16 = sshll.u32 %s7033_s15, 4  ;;  %s29_s18 = sshll.u32 %s7034_s17, 4  ;;  %s42_s16 = int_to_ptr.vmem [resolvable:$true] %s41_s16  ;;  %s7102_s18 = int_to_ptr.vmem [resolvable:$true] %s29_s18 }
   0x7   :  { %s6939_s21 = scalar_lea.hbm %s7401_s3, 20480 }
   0x8   :  { %p6940_p0 = scmp.ne.s32.totalorder %s7401_s3, %s6939_s21  ;;  %p6943_p1 = scmp.lt.u32.totalorder %s6939_s21, %s7401_s3 }
   0xa   :  { %p6945_p2 = pnand %p6943_p1, %p6940_p0 }
   0xc   :  { %6948 = shalt.err (!%p6945_p2)
}
   0xd   :  { %s6949_s25 = scalar_lea.vmem %s42_s16, 20480  ;;  %p6954_p4 = scmp.lt.s32.totalorder %s42_s16, %s42_s16 }
   0xe   :  { %p6950_p3 = scmp.ne.s32.totalorder %s42_s16, %s6949_s25  ;;  %p6955_p5 = scmp.lt.s32.totalorder %s6949_s25, %s6949_s25 }
  0x10   :  { %p6956_p6 = por %p6955_p5, %p6954_p4 }
  0x12   :  { %p6957_p7 = pnand %p6956_p6, %p6950_p3 }
  0x14   :  { %6960 = shalt.err (!%p6957_p7)
}
  0x15   :  { %s7035_s26 = smov 320   ;;  %s7036_s27 = smov 20  }
  0x16   :  { %47 = dma.hbm_to_vmem [thread:$0]  %s7401_s3, 20480, %s42_s16, [#allocation6], %s7035_s26, %s7035_s26, %s7036_s27  }
  0x17   :  { %s6961_s12 = scalar_lea.hbm %s7400_s2, 20480 }
  0x18   :  { %p6962_p8 = scmp.ne.s32.totalorder %s7400_s2, %s6961_s12  ;;  %p6965_p9 = scmp.lt.u32.totalorder %s6961_s12, %s7400_s2 }
  0x1a   :  { %p6967_p10 = pnand %p6965_p9, %p6962_p8 }
  0x1c   :  { %6970 = shalt.err (!%p6967_p10)
}
  0x1d   :  { %s6971_s19 = scalar_lea.vmem %s7102_s18, 20480  ;;  %p6976_p12 = scmp.lt.s32.totalorder %s7102_s18, %s7102_s18 }
  0x1e   :  { %p6972_p11 = scmp.ne.s32.totalorder %s7102_s18, %s6971_s19  ;;  %p6977_p13 = scmp.lt.s32.totalorder %s6971_s19, %s6971_s19 }
  0x20   :  { %p6978_p0 = por %p6977_p13, %p6976_p12 }
  0x22   :  { %p6979_p1 = pnand %p6978_p0, %p6972_p11 }
  0x24   :  { %6982 = shalt.err (!%p6979_p1)
}
  0x25   :  { %35 = dma.hbm_to_vmem [thread:$0]  %s7400_s2, 20480, %s7102_s18, [#allocation4], %s7035_s26, %s7035_s26, %s7036_s27  }
  0x26   :  { %s7037_s20 = smov [#allocation7]   ;;  %s7038_s22 = smov [#allocation8]  }
  0x27   :  { %s53_s21 = sshll.u32 %s7037_s20, 4  ;;  %s67_s23 = sshll.u32 %s7038_s22, 4  ;;  %s54_s21 = int_to_ptr.vmem [resolvable:$true] %s53_s21  ;;  %s7139_s23 = int_to_ptr.vmem [resolvable:$true] %s67_s23 }
  0x28   :  { %s6983_s25 = scalar_lea.hbm %s7402_s4, 20480 }
  0x29   :  { %p6984_p2 = scmp.ne.s32.totalorder %s7402_s4, %s6983_s25  ;;  %p6987_p3 = scmp.lt.u32.totalorder %s6983_s25, %s7402_s4 }
  0x2b   :  { %p6989_p4 = pnand %p6987_p3, %p6984_p2 }
  0x2d   :  { %6992 = shalt.err (!%p6989_p4)
}
  0x2e   :  { %s6993_s2 = scalar_lea.vmem %s54_s21, 20480  ;;  %p6998_p6 = scmp.lt.s32.totalorder %s54_s21, %s54_s21 }
  0x2f   :  { %p6994_p5 = scmp.ne.s32.totalorder %s54_s21, %s6993_s2  ;;  %p6999_p7 = scmp.lt.s32.totalorder %s6993_s2, %s6993_s2 }
  0x31   :  { %p7000_p8 = por %p6999_p7, %p6998_p6 }
  0x33   :  { %p7001_p9 = pnand %p7000_p8, %p6994_p5 }
  0x35   :  { %7004 = shalt.err (!%p7001_p9)
}
  0x36   :  { %59 = dma.hbm_to_vmem [thread:$0]  %s7402_s4, 20480, %s54_s21, [#allocation6], %s7035_s26, %s7035_s26, %s7036_s27  }
  0x37   :  { %s7005_s15 = scalar_lea.hbm %s7404_s6, 15360 }
  0x38   :  { %p7006_p10 = scmp.ne.s32.totalorder %s7404_s6, %s7005_s15  ;;  %p7009_p11 = scmp.lt.u32.totalorder %s7005_s15, %s7404_s6 }
  0x3a   :  { %p7011_p12 = pnand %p7009_p11, %p7006_p10 }
  0x3c   :  { %7014 = shalt.err (!%p7011_p12)
}
  0x3d   :  { %s7015_s20 = scalar_lea.vmem %s7139_s23, 15360  ;;  %p7020_p0 = scmp.lt.s32.totalorder %s7139_s23, %s7139_s23 }
  0x3e   :  { %p7016_p13 = scmp.ne.s32.totalorder %s7139_s23, %s7015_s20  ;;  %p7021_p1 = scmp.lt.s32.totalorder %s7015_s20, %s7015_s20 }
  0x40   :  { %p7022_p2 = por %p7021_p1, %p7020_p0 }
  0x42   :  { %p7023_p3 = pnand %p7022_p2, %p7016_p13 }
  0x44   :  { %7026 = shalt.err (!%p7023_p3)
}
  0x45   :  { %s7039_s4 = smov 192   ;;  %s7040_s26 = smov 12  }
  0x46   :  { %73 = dma.hbm_to_vmem [thread:$0]  %s7404_s6, 15360, %s7139_s23, [#allocation9], %s7039_s4, %s7039_s4, %s7040_s26  }
  0x47   :  { %7027 = dma.done.wait [#allocation4], 20480  }
  0x48   :  { %7028 = vsyncadd [#allocation4], 4294946816 }
  0x49   :  { %7029 = dma.done.wait [#allocation6], 40960  }
  0x4a   :  { %7030 = vsyncadd [#allocation6], 4294926336 }
  0x4b   :  { %7031 = dma.done.wait [#allocation9], 15360  }
  0x4c   :  { %7032 = vsyncadd [#allocation9], 4294951936  ;;  %v6091_v1 = vld [vmem:[#allocation5 + $0x4] ss:$20 sps:$4 sm:$0xff]   ;;  %v6093_v2 = vld [vmem:[#allocation5 + $0xc] ss:$20 sps:$4 sm:$0xff]  }
  0x4d   :  { %1345 = vmatprep.subr.bf16.mxu0 %v6091_v1  ;;  %v6095_v3 = vld [vmem:[#allocation5] ss:$20 sps:$4 sm:$0xff]   ;;  %v6096_v4 = vld [vmem:[#allocation5 + $0x8] ss:$20 sps:$4 sm:$0xff]   ;;  %1431 = vmatprep.subr.bf16.mxu1 %v6093_v2  ;;  %v6102_v8 = vld [vmem:[#allocation5 + $0x30] ss:$20 sps:$4 sm:$0xff]  }
  0x4e   :  { %v6097_v5 = vld [vmem:[#allocation5 + $0x2c] ss:$20 sps:$4 sm:$0xff]   ;;  %1346 = vmatpush1.bf16.msra.mxu0 %v6095_v3  ;;  %1432 = vmatpush1.bf16.msra.mxu1 %v6096_v4  ;;  %v6099_v6 = vld [vmem:[#allocation5 + $0x34] ss:$20 sps:$4 sm:$0xff]   ;;  %v6105_v10 = vld [vmem:[#allocation5 + $0x5c] ss:$20 sps:$4 sm:$0xff]  }
  0x4f   :  { %v6101_v7 = vld [vmem:[#allocation5 + $0x28] ss:$20 sps:$4 sm:$0xff]   ;;  %1347 = vmatprep.subr.bf16.mxu0 %v6097_v5  ;;  %1433 = vmatprep.subr.bf16.mxu1 %v6099_v6  ;;  %v6107_v11 = vld [vmem:[#allocation5 + $0x50] ss:$20 sps:$4 sm:$0xff]   ;;  %v6108_v12 = vld [vmem:[#allocation5 + $0x58] ss:$20 sps:$4 sm:$0xff]  }
  0x50   :  { %v6103_v9 = vld [vmem:[#allocation5 + $0x54] ss:$20 sps:$4 sm:$0xff]   ;;  %v6109_v13 = vld [vmem:[#allocation5 + $0x7c] ss:$20 sps:$4 sm:$0xff]   ;;  %v6111_v14 = vld [vmem:[#allocation5 + $0x84] ss:$20 sps:$4 sm:$0xff]  }
  0x51   :  { %v6113_v15 = vld [vmem:[#allocation5 + $0x78] ss:$20 sps:$4 sm:$0xff]   ;;  %v6114_v16 = vld [vmem:[#allocation5 + $0x80] ss:$20 sps:$4 sm:$0xff]   ;;  %v6120_v20 = vld [vmem:[#allocation5 + $0xa8] ss:$20 sps:$4 sm:$0xff]  }
  0x52   :  { %1348 = vmatpush1.bf16.msra.mxu0 %v6101_v7  ;;  %1434 = vmatpush1.bf16.msra.mxu1 %v6102_v8  ;;  %v6115_v17 = vld [vmem:[#allocation5 + $0xa4] ss:$20 sps:$4 sm:$0xff]   ;;  %v6117_v18 = vld [vmem:[#allocation5 + $0xac] ss:$20 sps:$4 sm:$0xff]   ;;  %v6123_v22 = vld [vmem:[#allocation5 + $0xd4] ss:$20 sps:$4 sm:$0xff]  }
  0x53   :  { %1349 = vmatprep.subr.bf16.mxu0 %v6103_v9  ;;  %1435 = vmatprep.subr.bf16.mxu1 %v6105_v10  ;;  %v6119_v19 = vld [vmem:[#allocation5 + $0xa0] ss:$20 sps:$4 sm:$0xff]   ;;  %v6125_v23 = vld [vmem:[#allocation5 + $0xc8] ss:$20 sps:$4 sm:$0xff]   ;;  %v6126_v24 = vld [vmem:[#allocation5 + $0xd0] ss:$20 sps:$4 sm:$0xff]  }
  0x54   :  { %v6121_v21 = vld [vmem:[#allocation5 + $0xcc] ss:$20 sps:$4 sm:$0xff]   ;;  %v6127_v25 = vld [vmem:[#allocation5 + $0xf4] ss:$20 sps:$4 sm:$0xff]   ;;  %v6129_v26 = vld [vmem:[#allocation5 + $0xfc] ss:$20 sps:$4 sm:$0xff]  }
  0x55   :  { %v6131_v27 = vld [vmem:[#allocation5 + $0xf0] ss:$20 sps:$4 sm:$0xff]   ;;  %v6132_v28 = vld [vmem:[#allocation5 + $0xf8] ss:$20 sps:$4 sm:$0xff]   ;;  %v6138_v32 = vld [vmem:[#allocation5 + $0x120] ss:$20 sps:$4 sm:$0xff]  }
  0x56   :  { %1350 = vmatpush1.bf16.msra.mxu0 %v6107_v11  ;;  %1436 = vmatpush1.bf16.msra.mxu1 %v6108_v12  ;;  %v6133_v29 = vld [vmem:[#allocation5 + $0x11c] ss:$20 sps:$4 sm:$0xff]   ;;  %v6135_v30 = vld [vmem:[#allocation5 + $0x124] ss:$20 sps:$4 sm:$0xff]   ;;  %v6141_v34 = vld [vmem:[#allocation5 + $0x14c] ss:$20 sps:$4 sm:$0xff]  }
  0x57   :  { %1351 = vmatprep.subr.bf16.mxu0 %v6109_v13  ;;  %1437 = vmatprep.subr.bf16.mxu1 %v6111_v14  ;;  %v6137_v31 = vld [vmem:[#allocation5 + $0x118] ss:$20 sps:$4 sm:$0xff]   ;;  %v6143_v35 = vld [vmem:[#allocation5 + $0x140] ss:$20 sps:$4 sm:$0xff]   ;;  %v6144_v36 = vld [vmem:[#allocation5 + $0x148] ss:$20 sps:$4 sm:$0xff]  }
  0x58   :  { %v6139_v33 = vld [vmem:[#allocation5 + $0x144] ss:$20 sps:$4 sm:$0xff]   ;;  %v6145_v37 = vld [vmem:[#allocation5 + $0x16c] ss:$20 sps:$4 sm:$0xff]   ;;  %v6147_v38 = vld [vmem:[#allocation5 + $0x174] ss:$20 sps:$4 sm:$0xff]  }
  0x59   :  { %v6149_v39 = vld [vmem:[#allocation5 + $0x168] ss:$20 sps:$4 sm:$0xff]   ;;  %v6150_v40 = vld [vmem:[#allocation5 + $0x170] ss:$20 sps:$4 sm:$0xff]   ;;  %v6156_v44 = vld [vmem:[#allocation5 + $0x198] ss:$20 sps:$4 sm:$0xff]  }
  0x5a   :  { %1352 = vmatpush1.bf16.msra.mxu0 %v6113_v15  ;;  %1438 = vmatpush1.bf16.msra.mxu1 %v6114_v16  ;;  %v6151_v41 = vld [vmem:[#allocation5 + $0x194] ss:$20 sps:$4 sm:$0xff]   ;;  %v6153_v42 = vld [vmem:[#allocation5 + $0x19c] ss:$20 sps:$4 sm:$0xff]   ;;  %v6159_v46 = vld [vmem:[#allocation5 + $0x1c4] ss:$20 sps:$4 sm:$0xff]  }
  0x5b   :  { %1353 = vmatprep.subr.bf16.mxu0 %v6115_v17  ;;  %1439 = vmatprep.subr.bf16.mxu1 %v6117_v18  ;;  %v6155_v43 = vld [vmem:[#allocation5 + $0x190] ss:$20 sps:$4 sm:$0xff]   ;;  %v6161_v49 = vld [vmem:[#allocation5 + $0x1b8] ss:$20 sps:$4 sm:$0xff]   ;;  %v6162_v50 = vld [vmem:[#allocation5 + $0x1c0] ss:$20 sps:$4 sm:$0xff]  }
  0x5c   :  { %v6157_v45 = vld [vmem:[#allocation5 + $0x1bc] ss:$20 sps:$4 sm:$0xff]   ;;  %v6163_v52 = vld [vmem:[#allocation5 + $0x1e4] ss:$20 sps:$4 sm:$0xff]   ;;  %v6165_v53 = vld [vmem:[#allocation5 + $0x1ec] ss:$20 sps:$4 sm:$0xff]  }
  0x5d   :  { %v97_v47 = vld [vmem:[%s7399_s1] sm:$0xff]  ;;  %v99_v48 = vld [vmem:[%s7399_s1 + $0x10] sm:$0xff]  ;;  %vm7043_vm8 = vmmov 0   ;;  %vm5200_vm11 = vcmask 7168  }
  0x5e   :  { %1354 = vmatpush1.bf16.msra.mxu0 %v6119_v19  ;;  %1440 = vmatpush1.bf16.msra.mxu1 %v6120_v20  ;;  %v7179_v51 = vcombine.high %v97_v47, %v99_v48  ;;  %v6167_v54 = vld [vmem:[#allocation5 + $0x1e0] ss:$20 sps:$4 sm:$0xff]   ;;  %v6168_v55 = vld [vmem:[#allocation5 + $0x1e8] ss:$20 sps:$4 sm:$0xff]   ;;  %v6174_v59 = vld [vmem:[#allocation5 + $0x210] ss:$20 sps:$4 sm:$0xff]   ;;  %v7183_v6 = vcombine.low %v97_v47, %v99_v48 }
  0x5f   :  { %1355 = vmatprep.subr.bf16.mxu0 %v6121_v21  ;;  %1441 = vmatprep.subr.bf16.mxu1 %v6123_v22  ;;  %v6169_v56 = vld [vmem:[#allocation5 + $0x20c] ss:$20 sps:$4 sm:$0xff]   ;;  %v6171_v57 = vld [vmem:[#allocation5 + $0x214] ss:$20 sps:$4 sm:$0xff]   ;;  %v6177_v61 = vld [vmem:[#allocation5 + $0x23c] ss:$20 sps:$4 sm:$0xff]  }
  0x60   :  { %1377 = vmatprep.mubr.bf16.mxu0 %v7179_v51  ;;  %1463 = vmatprep.mubr.bf16.mxu1 %v7179_v51  ;;  %v6173_v58 = vld [vmem:[#allocation5 + $0x208] ss:$20 sps:$4 sm:$0xff]   ;;  %v6179_v62 = vld [vmem:[#allocation5 + $0x230] ss:$20 sps:$4 sm:$0xff]   ;;  %v6180_v63 = vld [vmem:[#allocation5 + $0x238] ss:$20 sps:$4 sm:$0xff]  }
  0x61   :  { %v6175_v60 = vld [vmem:[#allocation5 + $0x234] ss:$20 sps:$4 sm:$0xff]   ;;  %v6181_v0 = vld [vmem:[#allocation5 + $0x25c] ss:$20 sps:$4 sm:$0xff]   ;;  %v6183_v1 = vld [vmem:[#allocation5 + $0x264] ss:$20 sps:$4 sm:$0xff]  }
  0x62   :  { %1356 = vmatpush1.bf16.msra.mxu0 %v6125_v23  ;;  %1442 = vmatpush1.bf16.msra.mxu1 %v6126_v24  ;;  %v6185_v2 = vld [vmem:[#allocation5 + $0x258] ss:$20 sps:$4 sm:$0xff]   ;;  %v6186_v3 = vld [vmem:[#allocation5 + $0x260] ss:$20 sps:$4 sm:$0xff]   ;;  %v6191_v8 = vld [vmem:[#allocation5 + $0x288] ss:$20 sps:$4 sm:$0xff]  }
  0x63   :  { %1357 = vmatprep.subr.bf16.mxu0 %v6127_v25  ;;  %1443 = vmatprep.subr.bf16.mxu1 %v6129_v26  ;;  %v6190_v4 = vld [vmem:[#allocation5 + $0x284] ss:$20 sps:$4 sm:$0xff]   ;;  %v6193_v5 = vld [vmem:[#allocation5 + $0x28c] ss:$20 sps:$4 sm:$0xff]   ;;  %v6200_v10 = vld [vmem:[#allocation5 + $0x2b4] ss:$20 sps:$4 sm:$0xff]  }
  0x64   :  { %v6188_v7 = vld [vmem:[#allocation5 + $0x280] ss:$20 sps:$4 sm:$0xff]   ;;  %v6195_v11 = vld [vmem:[#allocation5 + $0x2a8] ss:$20 sps:$4 sm:$0xff]   ;;  %v6198_v12 = vld [vmem:[#allocation5 + $0x2b0] ss:$20 sps:$4 sm:$0xff]  }
  0x65   :  { %v6197_v9 = vld [vmem:[#allocation5 + $0x2ac] ss:$20 sps:$4 sm:$0xff]   ;;  %v6203_v13 = vld [vmem:[#allocation5 + $0x2d4] ss:$20 sps:$4 sm:$0xff]   ;;  %v6206_v14 = vld [vmem:[#allocation5 + $0x2dc] ss:$20 sps:$4 sm:$0xff]  }
  0x66   :  { %1358 = vmatpush1.bf16.msra.mxu0 %v6131_v27  ;;  %1444 = vmatpush1.bf16.msra.mxu1 %v6132_v28  ;;  %v6201_v15 = vld [vmem:[#allocation5 + $0x2d0] ss:$20 sps:$4 sm:$0xff]   ;;  %v6204_v16 = vld [vmem:[#allocation5 + $0x2d8] ss:$20 sps:$4 sm:$0xff]   ;;  %v6210_v20 = vld [vmem:[#allocation5 + $0x300] ss:$20 sps:$4 sm:$0xff]  }
  0x67   :  { %1359 = vmatprep.subr.bf16.mxu0 %v6133_v29  ;;  %1445 = vmatprep.subr.bf16.mxu1 %v6135_v30  ;;  %v6209_v17 = vld [vmem:[#allocation5 + $0x2fc] ss:$20 sps:$4 sm:$0xff]   ;;  %v6212_v18 = vld [vmem:[#allocation5 + $0x304] ss:$20 sps:$4 sm:$0xff]   ;;  %v6218_v22 = vld [vmem:[#allocation5 + $0x32c] ss:$20 sps:$4 sm:$0xff]  }
  0x68   :  { %v6207_v19 = vld [vmem:[#allocation5 + $0x2f8] ss:$20 sps:$4 sm:$0xff]   ;;  %v6213_v23 = vld [vmem:[#allocation5 + $0x320] ss:$20 sps:$4 sm:$0xff]   ;;  %v6216_v24 = vld [vmem:[#allocation5 + $0x328] ss:$20 sps:$4 sm:$0xff]  }
  0x69   :  { %v6215_v21 = vld [vmem:[#allocation5 + $0x324] ss:$20 sps:$4 sm:$0xff]   ;;  %v6221_v25 = vld [vmem:[#allocation5 + $0x34c] ss:$20 sps:$4 sm:$0xff]   ;;  %v6224_v26 = vld [vmem:[#allocation5 + $0x354] ss:$20 sps:$4 sm:$0xff]  }
  0x6a   :  { %1360 = vmatpush1.bf16.msra.mxu0 %v6137_v31  ;;  %1446 = vmatpush1.bf16.msra.mxu1 %v6138_v32  ;;  %v6219_v27 = vld [vmem:[#allocation5 + $0x348] ss:$20 sps:$4 sm:$0xff]   ;;  %v6222_v28 = vld [vmem:[#allocation5 + $0x350] ss:$20 sps:$4 sm:$0xff]  }
  0x6b   :  { %1361 = vmatprep.subr.bf16.mxu0 %v6139_v33  ;;  %1447 = vmatprep.subr.bf16.mxu1 %v6141_v34  ;;  %v6227_v29 = vld [vmem:[#allocation5 + $0x374] ss:$20 sps:$4 sm:$0xff]   ;;  %v6230_v30 = vld [vmem:[#allocation5 + $0x37c] ss:$20 sps:$4 sm:$0xff]  }
  0x6c   :  { %v7190_v31 = vld [vmem:[%s7399_s1 + $0x8] sm:$0xff]  ;;  %v7195_v32 = vld [vmem:[%s7399_s1 + $0x18] sm:$0xff] }
  0x6d   :  { %v6225_v33 = vld [vmem:[#allocation5 + $0x370] ss:$20 sps:$4 sm:$0xff]   ;;  %v7199_v34 = vcombine.high %v7190_v31, %v7195_v32  ;;  %v6251_v48 = vld [vmem:[#allocation5 + $0x414] ss:$20 sps:$4 sm:$0xff]  }
  0x6e   :  { %1362 = vmatpush1.bf16.msra.mxu0 %v6143_v35  ;;  %1448 = vmatpush1.bf16.msra.mxu1 %v6144_v36  ;;  %v6228_v35 = vld [vmem:[#allocation5 + $0x378] ss:$20 sps:$4 sm:$0xff]   ;;  %v6233_v36 = vld [vmem:[#allocation5 + $0x39c] ss:$20 sps:$4 sm:$0xff]  }
  0x6f   :  { %1363 = vmatprep.subr.bf16.mxu0 %v6145_v37  ;;  %1449 = vmatprep.subr.bf16.mxu1 %v6147_v38  ;;  %v6236_v37 = vld [vmem:[#allocation5 + $0x3a4] ss:$20 sps:$4 sm:$0xff]  }
  0x70   :  { %v6231_v38 = vld [vmem:[#allocation5 + $0x398] ss:$20 sps:$4 sm:$0xff]   ;;  %v6246_v47 = vld [vmem:[#allocation5 + $0x3f0] ss:$20 sps:$4 sm:$0xff]  }
  0x72   :  { %1364 = vmatpush1.bf16.msra.mxu0 %v6149_v39  ;;  %1450 = vmatpush1.bf16.msra.mxu1 %v6150_v40  ;;  %v6234_v39 = vld [vmem:[#allocation5 + $0x3a0] ss:$20 sps:$4 sm:$0xff]   ;;  %v6239_v40 = vld [vmem:[#allocation5 + $0x3c4] ss:$20 sps:$4 sm:$0xff]  }
  0x73   :  { %1365 = vmatprep.subr.bf16.mxu0 %v6151_v41  ;;  %1451 = vmatprep.subr.bf16.mxu1 %v6153_v42  ;;  %v6242_v41 = vld [vmem:[#allocation5 + $0x3cc] ss:$20 sps:$4 sm:$0xff]  }
  0x74   :  { %v6237_v42 = vld [vmem:[#allocation5 + $0x3c0] ss:$20 sps:$4 sm:$0xff]  }
  0x76   :  { %1366 = vmatpush1.bf16.msra.mxu0 %v6155_v43  ;;  %1452 = vmatpush1.bf16.msra.mxu1 %v6156_v44  ;;  %v6240_v43 = vld [vmem:[#allocation5 + $0x3c8] ss:$20 sps:$4 sm:$0xff]   ;;  %v6245_v44 = vld [vmem:[#allocation5 + $0x3ec] ss:$20 sps:$4 sm:$0xff]  }
  0x77   :  { %1367 = vmatprep.subr.bf16.mxu0 %v6157_v45  ;;  %1453 = vmatprep.subr.bf16.mxu1 %v6159_v46  ;;  %v6248_v45 = vld [vmem:[#allocation5 + $0x3f4] ss:$20 sps:$4 sm:$0xff]  }
  0x78   :  { %v6243_v46 = vld [vmem:[#allocation5 + $0x3e8] ss:$20 sps:$4 sm:$0xff]  }
  0x7a   :  { %1368 = vmatpush1.bf16.msra.mxu0 %v6161_v49  ;;  %1454 = vmatpush1.bf16.msra.mxu1 %v6162_v50  ;;  %v6254_v49 = vld [vmem:[#allocation5 + $0x41c] ss:$20 sps:$4 sm:$0xff]  }
  0x7b   :  { %1369 = vmatprep.subr.bf16.mxu0 %v6163_v52  ;;  %1455 = vmatprep.subr.bf16.mxu1 %v6165_v53  ;;  %v6249_v50 = vld [vmem:[#allocation5 + $0x410] ss:$20 sps:$4 sm:$0xff]   ;;  %v6252_v52 = vld [vmem:[#allocation5 + $0x418] ss:$20 sps:$4 sm:$0xff]  }
  0x7c   :  { %v6257_v53 = vld [vmem:[#allocation5 + $0x43c] ss:$20 sps:$4 sm:$0xff]  }
  0x7e   :  { %1370 = vmatpush1.bf16.msra.mxu0 %v6167_v54  ;;  %1456 = vmatpush1.bf16.msra.mxu1 %v6168_v55  ;;  %v6260_v54 = vld [vmem:[#allocation5 + $0x444] ss:$20 sps:$4 sm:$0xff]  }
  0x7f   :  { %1371 = vmatprep.subr.bf16.mxu0 %v6169_v56  ;;  %1457 = vmatprep.subr.bf16.mxu1 %v6171_v57  ;;  %v6255_v55 = vld [vmem:[#allocation5 + $0x438] ss:$20 sps:$4 sm:$0xff]   ;;  %v6258_v56 = vld [vmem:[#allocation5 + $0x440] ss:$20 sps:$4 sm:$0xff]  }
  0x80   :  { %v6263_v57 = vld [vmem:[#allocation5 + $0x464] ss:$20 sps:$4 sm:$0xff]  }
  0x82   :  { %1372 = vmatpush1.bf16.msra.mxu0 %v6173_v58  ;;  %1458 = vmatpush1.bf16.msra.mxu1 %v6174_v59  ;;  %v6266_v58 = vld [vmem:[#allocation5 + $0x46c] ss:$20 sps:$4 sm:$0xff]  }
  0x83   :  { %1373 = vmatprep.subr.bf16.mxu0 %v6175_v60  ;;  %1459 = vmatprep.subr.bf16.mxu1 %v6177_v61  ;;  %v6261_v59 = vld [vmem:[#allocation5 + $0x460] ss:$20 sps:$4 sm:$0xff]   ;;  %v6264_v60 = vld [vmem:[#allocation5 + $0x468] ss:$20 sps:$4 sm:$0xff]  }
  0x84   :  { %v6269_v61 = vld [vmem:[#allocation5 + $0x48c] ss:$20 sps:$4 sm:$0xff]  }
  0x86   :  { %1374 = vmatpush1.bf16.msra.mxu0 %v6179_v62  ;;  %1460 = vmatpush1.bf16.msra.mxu1 %v6180_v63  ;;  %v6272_v62 = vld [vmem:[#allocation5 + $0x494] ss:$20 sps:$4 sm:$0xff]  }
  0x87   :  { %1375 = vmatprep.subr.bf16.mxu0 %v6181_v0  ;;  %1461 = vmatprep.subr.bf16.mxu1 %v6183_v1  ;;  %v6267_v63 = vld [vmem:[#allocation5 + $0x488] ss:$20 sps:$4 sm:$0xff]   ;;  %v6270_v0 = vld [vmem:[#allocation5 + $0x490] ss:$20 sps:$4 sm:$0xff]  }
  0x88   :  { %v6275_v1 = vld [vmem:[#allocation5 + $0x4b4] ss:$20 sps:$4 sm:$0xff]  }
  0x8a   :  { %1376 = vmatpush1.bf16.msra.mxu0 %v6185_v2  ;;  %1462 = vmatpush1.bf16.msra.mxu1 %v6186_v3  ;;  %v6278_v2 = vld [vmem:[#allocation5 + $0x4bc] ss:$20 sps:$4 sm:$0xff]  }
  0x8b   :  { %1388 = vmatprep.subr.bf16.mxu0 %v6190_v4  ;;  %1474 = vmatprep.subr.bf16.mxu1 %v6193_v5  ;;  %v6273_v3 = vld [vmem:[#allocation5 + $0x4b0] ss:$20 sps:$4 sm:$0xff]   ;;  %v6276_v4 = vld [vmem:[#allocation5 + $0x4b8] ss:$20 sps:$4 sm:$0xff]  }
  0x8c   :  { %v6281_v5 = vld [vmem:[#allocation5 + $0x4dc] ss:$20 sps:$4 sm:$0xff]  }
  0x8d   :  { %1378 = vmatmul.mubr.bf16.vlgmr.msra.gmra.mrb[0].mxu0 %v7183_v6  ;;  %1464 = vmatmul.mubr.bf16.vlgmr.msra.gmra.mrb[0].mxu1 %v7183_v6 }
  0x8e   :  { %1389 = vmatpush1.bf16.msra.mxu0 %v6188_v7  ;;  %1475 = vmatpush1.bf16.msra.mxu1 %v6191_v8  ;;  %v6284_v7 = vld [vmem:[#allocation5 + $0x4e4] ss:$20 sps:$4 sm:$0xff]  }
  0x8f   :  { %1390 = vmatprep.subr.bf16.mxu0 %v6197_v9  ;;  %1476 = vmatprep.subr.bf16.mxu1 %v6200_v10  ;;  %v6279_v8 = vld [vmem:[#allocation5 + $0x4d8] ss:$20 sps:$4 sm:$0xff]   ;;  %v6282_v9 = vld [vmem:[#allocation5 + $0x4e0] ss:$20 sps:$4 sm:$0xff]   ;;  %v6286_v10 = vld [vmem:[#allocation5 + $0x150] ss:$20 sps:$4 sm:$0xff]  }
  0x90   :  { %1420 = vmatprep.mubr.bf16.mxu0 %v7199_v34  ;;  %1506 = vmatprep.mubr.bf16.mxu1 %v7199_v34 }
  0x92   :  { %1391 = vmatpush1.bf16.msra.mxu0 %v6195_v11  ;;  %1477 = vmatpush1.bf16.msra.mxu1 %v6198_v12  ;;  %v6289_v11 = vld [vmem:[#allocation3 + $0x4] ss:$20 sps:$4 sm:$0xff]   ;;  %v6287_v12 = vld [vmem:[#allocation3] ss:$20 sps:$4 sm:$0xff]  }
  0x93   :  { %1392 = vmatprep.subr.bf16.mxu0 %v6203_v13  ;;  %1478 = vmatprep.subr.bf16.mxu1 %v6206_v14  ;;  %v7205_v13 = vcombine.low %v7190_v31, %v7195_v32  ;;  %v6291_v14 = vld [vmem:[#allocation5 + $0x10] ss:$20 sps:$4 sm:$0xff]   ;;  %v6308_v31 = vld [vmem:[#allocation3 + $0xa0] ss:$20 sps:$4 sm:$0xff]  }
  0x94   :  { %v6311_v32 = vld [vmem:[#allocation5 + $0xb0] ss:$20 sps:$4 sm:$0xff]  }
  0x96   :  { %1393 = vmatpush1.bf16.msra.mxu0 %v6201_v15  ;;  %1479 = vmatpush1.bf16.msra.mxu1 %v6204_v16  ;;  %v6292_v15 = vld [vmem:[#allocation5 + $0x178] ss:$20 sps:$4 sm:$0xff]  }
  0x97   :  { %1394 = vmatprep.subr.bf16.mxu0 %v6209_v17  ;;  %1480 = vmatprep.subr.bf16.mxu1 %v6212_v18  ;;  %v6295_v16 = vld [vmem:[#allocation3 + $0x2c] ss:$20 sps:$4 sm:$0xff]   ;;  %v6293_v17 = vld [vmem:[#allocation3 + $0x28] ss:$20 sps:$4 sm:$0xff]  }
  0x98   :  { %v6296_v18 = vld [vmem:[#allocation5 + $0x38] ss:$20 sps:$4 sm:$0xff]  }
  0x9a   :  { %1395 = vmatpush1.bf16.msra.mxu0 %v6207_v19  ;;  %1481 = vmatpush1.bf16.msra.mxu1 %v6210_v20  ;;  %v6297_v19 = vld [vmem:[#allocation5 + $0x1a0] ss:$20 sps:$4 sm:$0xff]  }
  0x9b   :  { %1396 = vmatprep.subr.bf16.mxu0 %v6215_v21  ;;  %1482 = vmatprep.subr.bf16.mxu1 %v6218_v22  ;;  %v6300_v20 = vld [vmem:[#allocation3 + $0x54] ss:$20 sps:$4 sm:$0xff]   ;;  %v6298_v21 = vld [vmem:[#allocation3 + $0x50] ss:$20 sps:$4 sm:$0xff]  }
  0x9c   :  { %v6301_v22 = vld [vmem:[#allocation5 + $0x60] ss:$20 sps:$4 sm:$0xff]  }
  0x9e   :  { %1397 = vmatpush1.bf16.msra.mxu0 %v6213_v23  ;;  %1483 = vmatpush1.bf16.msra.mxu1 %v6216_v24  ;;  %v6302_v23 = vld [vmem:[#allocation5 + $0x1c8] ss:$20 sps:$4 sm:$0xff]  }
  0x9f   :  { %1398 = vmatprep.subr.bf16.mxu0 %v6221_v25  ;;  %1484 = vmatprep.subr.bf16.mxu1 %v6224_v26  ;;  %v6305_v24 = vld [vmem:[#allocation3 + $0x7c] ss:$20 sps:$4 sm:$0xff]   ;;  %v6303_v25 = vld [vmem:[#allocation3 + $0x78] ss:$20 sps:$4 sm:$0xff]  }
  0xa0   :  { %v6306_v26 = vld [vmem:[#allocation5 + $0x88] ss:$20 sps:$4 sm:$0xff]  }
  0xa2   :  { %1399 = vmatpush1.bf16.msra.mxu0 %v6219_v27  ;;  %1485 = vmatpush1.bf16.msra.mxu1 %v6222_v28  ;;  %v7213_v27 = vld [vmem:[%s7398_s0] sm:$0xff] }
  0xa3   :  { %1400 = vmatprep.subr.bf16.mxu0 %v6227_v29  ;;  %1486 = vmatprep.subr.bf16.mxu1 %v6230_v30  ;;  %v6307_v28 = vld [vmem:[#allocation5 + $0x1f0] ss:$20 sps:$4 sm:$0xff]  }
  0xa4   :  { %v6310_v29 = vld [vmem:[#allocation3 + $0xa4] ss:$20 sps:$4 sm:$0xff]  }
  0xa6   :  { %1401 = vmatpush1.bf16.msra.mxu0 %v6225_v33  ;;  %1487 = vmatpush1.bf16.msra.mxu1 %v6228_v35  ;;  %v6312_v33 = vld [vmem:[#allocation5 + $0x218] ss:$20 sps:$4 sm:$0xff]  }
  0xa7   :  { %1402 = vmatprep.subr.bf16.mxu0 %v6233_v36  ;;  %1488 = vmatprep.subr.bf16.mxu1 %v6236_v37  ;;  %v6315_v35 = vld [vmem:[#allocation3 + $0xcc] ss:$20 sps:$4 sm:$0xff]   ;;  %v6313_v36 = vld [vmem:[#allocation3 + $0xc8] ss:$20 sps:$4 sm:$0xff]  }
  0xa8   :  { %v6316_v37 = vld [vmem:[#allocation5 + $0xd8] ss:$20 sps:$4 sm:$0xff]  }
  0xaa   :  { %1403 = vmatpush1.bf16.msra.mxu0 %v6231_v38  ;;  %1489 = vmatpush1.bf16.msra.mxu1 %v6234_v39  ;;  %v6317_v38 = vld [vmem:[#allocation5 + $0x240] ss:$20 sps:$4 sm:$0xff]  }
  0xab   :  { %1404 = vmatprep.subr.bf16.mxu0 %v6239_v40  ;;  %1490 = vmatprep.subr.bf16.mxu1 %v6242_v41  ;;  %v6320_v39 = vld [vmem:[#allocation3 + $0xf4] ss:$20 sps:$4 sm:$0xff]   ;;  %v6318_v40 = vld [vmem:[#allocation3 + $0xf0] ss:$20 sps:$4 sm:$0xff]  }
  0xac   :  { %v6321_v41 = vld [vmem:[#allocation5 + $0x100] ss:$20 sps:$4 sm:$0xff]  }
  0xae   :  { %1405 = vmatpush1.bf16.msra.mxu0 %v6237_v42  ;;  %1491 = vmatpush1.bf16.msra.mxu1 %v6240_v43  ;;  %v6322_v42 = vld [vmem:[#allocation5 + $0x268] ss:$20 sps:$4 sm:$0xff]  }
  0xaf   :  { %1406 = vmatprep.subr.bf16.mxu0 %v6245_v44  ;;  %1492 = vmatprep.subr.bf16.mxu1 %v6248_v45  ;;  %v6325_v43 = vld [vmem:[#allocation3 + $0x11c] ss:$20 sps:$4 sm:$0xff]   ;;  %v6323_v44 = vld [vmem:[#allocation3 + $0x118] ss:$20 sps:$4 sm:$0xff]  }
  0xb0   :  { %v6326_v45 = vld [vmem:[#allocation5 + $0x128] ss:$20 sps:$4 sm:$0xff]  }
  0xb2   :  { %1407 = vmatpush1.bf16.msra.mxu0 %v6243_v46  ;;  %1493 = vmatpush1.bf16.msra.mxu1 %v6246_v47  ;;  %v6327_v46 = vld [vmem:[#allocation5 + $0x3d0] ss:$20 sps:$4 sm:$0xff]  }
  0xb3   :  { %1408 = vmatprep.subr.bf16.mxu0 %v6251_v48  ;;  %1494 = vmatprep.subr.bf16.mxu1 %v6254_v49  ;;  %v6330_v47 = vld [vmem:[#allocation3 + $0x144] ss:$20 sps:$4 sm:$0xff]   ;;  %v6328_v48 = vld [vmem:[#allocation3 + $0x140] ss:$20 sps:$4 sm:$0xff]  }
  0xb4   :  { %v6331_v49 = vld [vmem:[#allocation5 + $0x290] ss:$20 sps:$4 sm:$0xff]  }
  0xb6   :  { %1409 = vmatpush1.bf16.msra.mxu0 %v6249_v50  ;;  %1495 = vmatpush1.bf16.msra.mxu1 %v6252_v52  ;;  %v6332_v50 = vld [vmem:[#allocation5 + $0x3f8] ss:$20 sps:$4 sm:$0xff]  }
  0xb7   :  { %1410 = vmatprep.subr.bf16.mxu0 %v6257_v53  ;;  %1496 = vmatprep.subr.bf16.mxu1 %v6260_v54  ;;  %v6335_v52 = vld [vmem:[#allocation3 + $0x16c] ss:$20 sps:$4 sm:$0xff]   ;;  %v6333_v53 = vld [vmem:[#allocation3 + $0x168] ss:$20 sps:$4 sm:$0xff]  }
  0xb8   :  { %v6336_v54 = vld [vmem:[#allocation5 + $0x2b8] ss:$20 sps:$4 sm:$0xff]  }
  0xba   :  { %1411 = vmatpush1.bf16.msra.mxu0 %v6255_v55  ;;  %1497 = vmatpush1.bf16.msra.mxu1 %v6258_v56  ;;  %v6337_v55 = vld [vmem:[#allocation5 + $0x420] ss:$20 sps:$4 sm:$0xff]  }
  0xbb   :  { %1412 = vmatprep.subr.bf16.mxu0 %v6263_v57  ;;  %1498 = vmatprep.subr.bf16.mxu1 %v6266_v58  ;;  %v6340_v56 = vld [vmem:[#allocation3 + $0x194] ss:$20 sps:$4 sm:$0xff]   ;;  %v6338_v57 = vld [vmem:[#allocation3 + $0x190] ss:$20 sps:$4 sm:$0xff]  }
  0xbc   :  { %v6341_v58 = vld [vmem:[#allocation5 + $0x2e0] ss:$20 sps:$4 sm:$0xff]  }
  0xbe   :  { %1413 = vmatpush1.bf16.msra.mxu0 %v6261_v59  ;;  %1499 = vmatpush1.bf16.msra.mxu1 %v6264_v60  ;;  %v6342_v59 = vld [vmem:[#allocation5 + $0x448] ss:$20 sps:$4 sm:$0xff]  }
  0xbf   :  { %1414 = vmatprep.subr.bf16.mxu0 %v6269_v61  ;;  %1500 = vmatprep.subr.bf16.mxu1 %v6272_v62  ;;  %v6345_v60 = vld [vmem:[#allocation3 + $0x1bc] ss:$20 sps:$4 sm:$0xff]  }
  0xc0   :  { %v6346_v61 = vld [vmem:[#allocation5 + $0x308] ss:$20 sps:$4 sm:$0xff]   ;;  %v6347_v62 = vld [vmem:[#allocation5 + $0x470] ss:$20 sps:$4 sm:$0xff]  }
  0xc2   :  { %1415 = vmatpush1.bf16.msra.mxu0 %v6267_v63  ;;  %1501 = vmatpush1.bf16.msra.mxu1 %v6270_v0  ;;  %v6350_v63 = vld [vmem:[#allocation3 + $0x1e4] ss:$20 sps:$4 sm:$0xff]   ;;  %v6348_v0 = vld [vmem:[#allocation3 + $0x1e0] ss:$20 sps:$4 sm:$0xff]  }
  0xc3   :  { %1416 = vmatprep.subr.bf16.mxu0 %v6275_v1  ;;  %1502 = vmatprep.subr.bf16.mxu1 %v6278_v2  ;;  %v6352_v1 = vld [vmem:[#allocation5 + $0x498] ss:$20 sps:$4 sm:$0xff]  }
  0xc4   :  { %v6355_v2 = vld [vmem:[#allocation3 + $0x20c] ss:$20 sps:$4 sm:$0xff]  }
  0xc6   :  { %1417 = vmatpush1.bf16.msra.mxu0 %v6273_v3  ;;  %1503 = vmatpush1.bf16.msra.mxu1 %v6276_v4  ;;  %v6353_v3 = vld [vmem:[#allocation3 + $0x208] ss:$20 sps:$4 sm:$0xff]   ;;  %v6356_v4 = vld [vmem:[#allocation5 + $0x358] ss:$20 sps:$4 sm:$0xff]  }
  0xc7   :  { %1418 = vmatprep.subr.bf16.mxu0 %v6281_v5  ;;  %1504 = vmatprep.subr.bf16.mxu1 %v6284_v7  ;;  %v6357_v5 = vld [vmem:[#allocation5 + $0x4c0] ss:$20 sps:$4 sm:$0xff]  }
  0xc8   :  { %v6360_v7 = vld [vmem:[#allocation3 + $0x234] ss:$20 sps:$4 sm:$0xff]  }
  0xca   :  { %1419 = vmatpush1.bf16.msra.mxu0 %v6279_v8  ;;  %1505 = vmatpush1.bf16.msra.mxu1 %v6282_v9  ;;  %v6358_v8 = vld [vmem:[#allocation3 + $0x230] ss:$20 sps:$4 sm:$0xff]   ;;  %v6361_v9 = vld [vmem:[#allocation5 + $0x380] ss:$20 sps:$4 sm:$0xff]  }
  0xcb   :  { %5823 = vmatprep.subr.bf16.mxu1 %v6286_v10  ;;  %2451 = vmatprep.subr.bf16.mxu0 %v6289_v11  ;;  %v6362_v10 = vld [vmem:[#allocation5 + $0x4e8] ss:$20 sps:$4 sm:$0xff]  }
  0xcc   :  { %v6365_v11 = vld [vmem:[#allocation3 + $0x25c] ss:$20 sps:$4 sm:$0xff]  }
  0xcd   :  { %1421 = vmatmul.mubr.bf16.vlgmr.msra.gmra.mrb[0].mxu0 %v7205_v13  ;;  %1507 = vmatmul.mubr.bf16.vlgmr.msra.gmra.mrb[0].mxu1 %v7205_v13 }
  0xce   :  { %5824 = vmatpush3.bf16.msra.mxu1 %v6291_v14  ;;  %2452 = vmatpush1.bf16.msra.mxu0 %v6287_v12  ;;  %v6363_v12 = vld [vmem:[#allocation3 + $0x258] ss:$20 sps:$4 sm:$0xff]   ;;  %v6366_v14 = vld [vmem:[#allocation5 + $0x3a8] ss:$20 sps:$4 sm:$0xff]  }
  0xcf   :  { %5825 = vmatprep.subr.bf16.mxu1 %v6292_v15  ;;  %2453 = vmatprep.subr.bf16.mxu0 %v6295_v16  ;;  %v6370_v15 = vld [vmem:[#allocation3 + $0x284] ss:$20 sps:$4 sm:$0xff]   ;;  %v6373_v16 = vld [vmem:[#allocation3 + $0xc] ss:$20 sps:$4 sm:$0xff]  }
  0xd0   :  { %1549 = vmatprep.mubr.bf16.mxu1 %v7179_v51  ;;  %v7218_v51 = vld [vmem:[%s7398_s0 + $0x10] sm:$0xff] }
  0xd1   :  { %v7222_v30 = vcombine.high %v7213_v27, %v7218_v51 }
  0xd2   :  { %5826 = vmatpush3.bf16.msra.mxu1 %v6296_v18  ;;  %2454 = vmatpush1.bf16.msra.mxu0 %v6293_v17  ;;  %v6368_v17 = vld [vmem:[#allocation3 + $0x280] ss:$20 sps:$4 sm:$0xff]   ;;  %v6371_v18 = vld [vmem:[#allocation3 + $0x8] ss:$20 sps:$4 sm:$0xff]  }
  0xd3   :  { %5827 = vmatprep.subr.bf16.mxu1 %v6297_v19  ;;  %2455 = vmatprep.subr.bf16.mxu0 %v6300_v20  ;;  %v7229_v19 = vcombine.low %v7213_v27, %v7218_v51  ;;  %v7234_v20 = vld [vmem:[%s7398_s0 + $0x8] sm:$0xff]  ;;  %v6386_v51 = vld [vmem:[#allocation3 + $0x5c] ss:$20 sps:$4 sm:$0xff]  }
  0xd4   :  { %2483 = vmatprep.mubr.bf16.mxu0 %v7222_v30  ;;  %v6383_v27 = vld [vmem:[#allocation3 + $0x2d4] ss:$20 sps:$4 sm:$0xff]  }
  0xd6   :  { %5828 = vmatpush3.bf16.msra.mxu1 %v6301_v22  ;;  %2456 = vmatpush1.bf16.msra.mxu0 %v6298_v21  ;;  %v7239_v21 = vld [vmem:[%s7398_s0 + $0x18] sm:$0xff]  ;;  %v6377_v22 = vld [vmem:[#allocation3 + $0x2ac] ss:$20 sps:$4 sm:$0xff]  }
  0xd7   :  { %5829 = vmatprep.subr.bf16.mxu1 %v6302_v23  ;;  %2457 = vmatprep.subr.bf16.mxu0 %v6305_v24  ;;  %v6380_v23 = vld [vmem:[#allocation3 + $0x34] ss:$20 sps:$4 sm:$0xff]  }
  0xd8   :  { %v6375_v24 = vld [vmem:[#allocation3 + $0x2a8] ss:$20 sps:$4 sm:$0xff]  }
  0xda   :  { %5830 = vmatpush3.bf16.msra.mxu1 %v6306_v26  ;;  %2458 = vmatpush1.bf16.msra.mxu0 %v6303_v25  ;;  %v7243_v25 = vcombine.high %v7234_v20, %v7239_v21  ;;  %v6378_v26 = vld [vmem:[#allocation3 + $0x30] ss:$20 sps:$4 sm:$0xff]  }
  0xdb   :  { %5831 = vmatprep.subr.bf16.mxu1 %v6307_v28  ;;  %2459 = vmatprep.subr.bf16.mxu0 %v6310_v29  ;;  %v6381_v28 = vld [vmem:[#allocation3 + $0x2d0] ss:$20 sps:$4 sm:$0xff]   ;;  %v6384_v29 = vld [vmem:[#allocation3 + $0x58] ss:$20 sps:$4 sm:$0xff]  }
  0xde   :  { %5832 = vmatpush3.bf16.msra.mxu1 %v6311_v32  ;;  %2460 = vmatpush1.bf16.msra.mxu0 %v6308_v31  ;;  %v6392_v31 = vld [vmem:[#allocation3 + $0x84] ss:$20 sps:$4 sm:$0xff]  }
  0xdf   :  { %5833 = vmatprep.subr.bf16.mxu1 %v6312_v33  ;;  %2461 = vmatprep.subr.bf16.mxu0 %v6315_v35  ;;  %v6387_v32 = vld [vmem:[#allocation3 + $0x2f8] ss:$20 sps:$4 sm:$0xff]   ;;  %v6390_v33 = vld [vmem:[#allocation3 + $0x80] ss:$20 sps:$4 sm:$0xff]  }
  0xe0   :  { %v6395_v35 = vld [vmem:[#allocation3 + $0x324] ss:$20 sps:$4 sm:$0xff]  }
  0xe2   :  { %5834 = vmatpush3.bf16.msra.mxu1 %v6316_v37  ;;  %2462 = vmatpush1.bf16.msra.mxu0 %v6313_v36  ;;  %v6398_v36 = vld [vmem:[#allocation3 + $0xac] ss:$20 sps:$4 sm:$0xff]  }
  0xe3   :  { %5835 = vmatprep.subr.bf16.mxu1 %v6317_v38  ;;  %2463 = vmatprep.subr.bf16.mxu0 %v6320_v39  ;;  %v6393_v37 = vld [vmem:[#allocation3 + $0x320] ss:$20 sps:$4 sm:$0xff]   ;;  %v6396_v38 = vld [vmem:[#allocation3 + $0xa8] ss:$20 sps:$4 sm:$0xff]  }
  0xe4   :  { %v6401_v39 = vld [vmem:[#allocation3 + $0x34c] ss:$20 sps:$4 sm:$0xff]  }
  0xe6   :  { %5836 = vmatpush3.bf16.msra.mxu1 %v6321_v41  ;;  %2464 = vmatpush1.bf16.msra.mxu0 %v6318_v40  ;;  %v6404_v40 = vld [vmem:[#allocation3 + $0xd4] ss:$20 sps:$4 sm:$0xff]  }
  0xe7   :  { %5837 = vmatprep.subr.bf16.mxu1 %v6322_v42  ;;  %2465 = vmatprep.subr.bf16.mxu0 %v6325_v43  ;;  %v6399_v41 = vld [vmem:[#allocation3 + $0x348] ss:$20 sps:$4 sm:$0xff]   ;;  %v6402_v42 = vld [vmem:[#allocation3 + $0xd0] ss:$20 sps:$4 sm:$0xff]  }
  0xe8   :  { %v6407_v43 = vld [vmem:[#allocation3 + $0x374] ss:$20 sps:$4 sm:$0xff]  }
  0xea   :  { %5838 = vmatpush3.bf16.msra.mxu1 %v6326_v45  ;;  %2466 = vmatpush1.bf16.msra.mxu0 %v6323_v44  ;;  %v6410_v44 = vld [vmem:[#allocation3 + $0xfc] ss:$20 sps:$4 sm:$0xff]  }
  0xeb   :  { %5845 = vmatprep.subr.bf16.mxu1 %v6327_v46  ;;  %2467 = vmatprep.subr.bf16.mxu0 %v6330_v47  ;;  %v6405_v45 = vld [vmem:[#allocation3 + $0x370] ss:$20 sps:$4 sm:$0xff]   ;;  %v6408_v46 = vld [vmem:[#allocation3 + $0xf8] ss:$20 sps:$4 sm:$0xff]  }
  0xec   :  { %v6413_v47 = vld [vmem:[#allocation3 + $0x39c] ss:$20 sps:$4 sm:$0xff]  }
  0xed   :  { %1550 = vmatmul.mubr.bf16.vlgmr.msra.gmra.mrb[4].mxu1 %v7183_v6  ;;  %v6343_v6 = vld [vmem:[#allocation3 + $0x1b8] ss:$20 sps:$4 sm:$0xff]  }
  0xee   :  { %5846 = vmatpush3.bf16.msra.mxu1 %v6331_v49  ;;  %2468 = vmatpush1.bf16.msra.mxu0 %v6328_v48  ;;  %v6416_v48 = vld [vmem:[#allocation3 + $0x124] ss:$20 sps:$4 sm:$0xff]  }
  0xef   :  { %5847 = vmatprep.subr.bf16.mxu1 %v6332_v50  ;;  %2469 = vmatprep.subr.bf16.mxu0 %v6335_v52  ;;  %v6411_v49 = vld [vmem:[#allocation3 + $0x398] ss:$20 sps:$4 sm:$0xff]   ;;  %v6414_v50 = vld [vmem:[#allocation3 + $0x120] ss:$20 sps:$4 sm:$0xff]  }
  0xf0   :  { %1590 = vmatprep.mubr.bf16.mxu1 %v7199_v34  ;;  %v6351_v34 = vld [vmem:[#allocation5 + $0x330] ss:$20 sps:$4 sm:$0xff]  }
  0xf1   :  { %v6419_v52 = vld [vmem:[#allocation3 + $0x3c4] ss:$20 sps:$4 sm:$0xff]  }
  0xf2   :  { %5848 = vmatpush3.bf16.msra.mxu1 %v6336_v54  ;;  %2470 = vmatpush1.bf16.msra.mxu0 %v6333_v53  ;;  %v6422_v53 = vld [vmem:[#allocation3 + $0x14c] ss:$20 sps:$4 sm:$0xff]  }
  0xf3   :  { %5849 = vmatprep.subr.bf16.mxu1 %v6337_v55  ;;  %2471 = vmatprep.subr.bf16.mxu0 %v6340_v56  ;;  %v6417_v54 = vld [vmem:[#allocation3 + $0x3c0] ss:$20 sps:$4 sm:$0xff]   ;;  %v6420_v55 = vld [vmem:[#allocation3 + $0x148] ss:$20 sps:$4 sm:$0xff]  }
  0xf4   :  { %v6425_v56 = vld [vmem:[#allocation3 + $0x3ec] ss:$20 sps:$4 sm:$0xff]  }
  0xf6   :  { %5850 = vmatpush3.bf16.msra.mxu1 %v6341_v58  ;;  %2472 = vmatpush1.bf16.msra.mxu0 %v6338_v57  ;;  %v6428_v57 = vld [vmem:[#allocation3 + $0x174] ss:$20 sps:$4 sm:$0xff]  }
  0xf7   :  { %5851 = vmatprep.subr.bf16.mxu1 %v6342_v59  ;;  %2473 = vmatprep.subr.bf16.mxu0 %v6345_v60  ;;  %v6423_v58 = vld [vmem:[#allocation3 + $0x3e8] ss:$20 sps:$4 sm:$0xff]   ;;  %v6426_v59 = vld [vmem:[#allocation3 + $0x170] ss:$20 sps:$4 sm:$0xff]  }
  0xf8   :  { %v6431_v60 = vld [vmem:[#allocation3 + $0x414] ss:$20 sps:$4 sm:$0xff]  }
  0xfa   :  { %5852 = vmatpush3.bf16.msra.mxu1 %v6346_v61  ;;  %2474 = vmatpush1.bf16.msra.mxu0 %v6343_v6  ;;  %v6434_v6 = vld [vmem:[#allocation3 + $0x19c] ss:$20 sps:$4 sm:$0xff]  }
  0xfb   :  { %5853 = vmatprep.subr.bf16.mxu1 %v6347_v62  ;;  %2475 = vmatprep.subr.bf16.mxu0 %v6350_v63  ;;  %v6429_v61 = vld [vmem:[#allocation3 + $0x410] ss:$20 sps:$4 sm:$0xff]   ;;  %v6432_v62 = vld [vmem:[#allocation3 + $0x198] ss:$20 sps:$4 sm:$0xff]  }
  0xfc   :  { %v6437_v63 = vld [vmem:[#allocation3 + $0x43c] ss:$20 sps:$4 sm:$0xff]  }
  0xfe   :  { %5854 = vmatpush3.bf16.msra.mxu1 %v6351_v34  ;;  %2476 = vmatpush1.bf16.msra.mxu0 %v6348_v0  ;;  %v6440_v0 = vld [vmem:[#allocation3 + $0x1c4] ss:$20 sps:$4 sm:$0xff]  }
  0xff   :  { %5855 = vmatprep.subr.bf16.mxu1 %v6352_v1  ;;  %2477 = vmatprep.subr.bf16.mxu0 %v6355_v2  ;;  %v6435_v34 = vld [vmem:[#allocation3 + $0x438] ss:$20 sps:$4 sm:$0xff]   ;;  %v6438_v1 = vld [vmem:[#allocation3 + $0x1c0] ss:$20 sps:$4 sm:$0xff]  }
 0x100   :  { %v6443_v2 = vld [vmem:[#allocation3 + $0x464] ss:$20 sps:$4 sm:$0xff]  }
 0x102   :  { %5856 = vmatpush3.bf16.msra.mxu1 %v6356_v4  ;;  %2478 = vmatpush1.bf16.msra.mxu0 %v6353_v3  ;;  %v6446_v3 = vld [vmem:[#allocation3 + $0x1ec] ss:$20 sps:$4 sm:$0xff]  }
 0x103   :  { %5857 = vmatprep.subr.bf16.mxu1 %v6357_v5  ;;  %2479 = vmatprep.subr.bf16.mxu0 %v6360_v7  ;;  %v6441_v4 = vld [vmem:[#allocation3 + $0x460] ss:$20 sps:$4 sm:$0xff]   ;;  %v6444_v5 = vld [vmem:[#allocation3 + $0x1e8] ss:$20 sps:$4 sm:$0xff]  }
 0x104   :  { %v6449_v7 = vld [vmem:[#allocation3 + $0x48c] ss:$20 sps:$4 sm:$0xff]  }
 0x106   :  { %5858 = vmatpush3.bf16.msra.mxu1 %v6361_v9  ;;  %2480 = vmatpush1.bf16.msra.mxu0 %v6358_v8  ;;  %v6452_v8 = vld [vmem:[#allocation3 + $0x214] ss:$20 sps:$4 sm:$0xff]  }
 0x107   :  { %5859 = vmatprep.subr.bf16.mxu1 %v6362_v10  ;;  %2481 = vmatprep.subr.bf16.mxu0 %v6365_v11  ;;  %v6447_v9 = vld [vmem:[#allocation3 + $0x488] ss:$20 sps:$4 sm:$0xff]   ;;  %v6450_v10 = vld [vmem:[#allocation3 + $0x210] ss:$20 sps:$4 sm:$0xff]  }
 0x108   :  { %v6455_v11 = vld [vmem:[#allocation3 + $0x4b4] ss:$20 sps:$4 sm:$0xff]  }
 0x10a   :  { %5860 = vmatpush3.bf16.msra.mxu1 %v6366_v14  ;;  %2482 = vmatpush1.bf16.msra.mxu0 %v6363_v12  ;;  %v6458_v12 = vld [vmem:[#allocation3 + $0x23c] ss:$20 sps:$4 sm:$0xff]  }
 0x10b   :  { %2494 = vmatprep.subr.bf16.mxu0 %v6370_v15  ;;  %2537 = vmatprep.subr.bf16.mxu1 %v6373_v16  ;;  %v6453_v14 = vld [vmem:[#allocation3 + $0x4b0] ss:$20 sps:$4 sm:$0xff]   ;;  %v6456_v15 = vld [vmem:[#allocation3 + $0x238] ss:$20 sps:$4 sm:$0xff]  }
 0x10c   :  { %v6461_v16 = vld [vmem:[#allocation3 + $0x4dc] ss:$20 sps:$4 sm:$0xff]  }
 0x10d   :  { %1591 = vmatmul.mubr.bf16.vlgmr.msra.gmra.mrb[8].mxu1 %v7205_v13  ;;  %2484 = vmatmul.mubr.bf16.vlgmr.msra.gmra.mrb[0].mxu0 %v7229_v19  ;;  %v6389_v13 = vld [vmem:[#allocation3 + $0x2fc] ss:$20 sps:$4 sm:$0xff]  }
 0x10e   :  { %2495 = vmatpush1.bf16.msra.mxu0 %v6368_v17  ;;  %2538 = vmatpush1.bf16.msra.mxu1 %v6371_v18  ;;  %v6464_v17 = vld [vmem:[#allocation3 + $0x264] ss:$20 sps:$4 sm:$0xff]  }
 0x10f   :  { %2496 = vmatprep.subr.bf16.mxu0 %v6377_v22  ;;  %2539 = vmatprep.subr.bf16.mxu1 %v6380_v23  ;;  %v6459_v18 = vld [vmem:[#allocation3 + $0x4d8] ss:$20 sps:$4 sm:$0xff]   ;;  %v6462_v22 = vld [vmem:[#allocation3 + $0x260] ss:$20 sps:$4 sm:$0xff]  }
 0x110   :  { %2526 = vmatprep.mubr.bf16.mxu0 %v7243_v25  ;;  %2569 = vmatprep.mubr.bf16.mxu1 %v7222_v30  ;;  %v6468_v23 = vld [vmem:[#allocation3 + $0x28c] ss:$20 sps:$4 sm:$0xff]  }
 0x112   :  { %2497 = vmatpush1.bf16.msra.mxu0 %v6375_v24  ;;  %2540 = vmatpush1.bf16.msra.mxu1 %v6378_v26  ;;  %v6469_v24 = vld [vmem:[#allocation3 + $0x150] ss:$20 sps:$4 sm:$0xff]   ;;  %v6466_v26 = vld [vmem:[#allocation3 + $0x288] ss:$20 sps:$4 sm:$0xff]  }
 0x113   :  { %2498 = vmatprep.subr.bf16.mxu0 %v6383_v27  ;;  %2541 = vmatprep.subr.bf16.mxu1 %v6386_v51  ;;  %v7251_v27 = vcombine.low %v7234_v20, %v7239_v21  ;;  %v6471_v51 = vld [vmem:[#allocation3 + $0x10] ss:$20 sps:$4 sm:$0xff]   ;;  %v6480_v20 = vld [vmem:[#allocation3 + $0x1a0] ss:$20 sps:$4 sm:$0xff]   ;;  %v6477_v21 = vld [vmem:[#allocation3 + $0x2d8] ss:$20 sps:$4 sm:$0xff]  }
 0x116   :  { %2499 = vmatpush1.bf16.msra.mxu0 %v6381_v28  ;;  %2542 = vmatpush1.bf16.msra.mxu1 %v6384_v29  ;;  %v6474_v28 = vld [vmem:[#allocation3 + $0x2b4] ss:$20 sps:$4 sm:$0xff]   ;;  %v6475_v29 = vld [vmem:[#allocation3 + $0x178] ss:$20 sps:$4 sm:$0xff]  }
 0x117   :  { %2500 = vmatprep.subr.bf16.mxu0 %v6389_v13  ;;  %2543 = vmatprep.subr.bf16.mxu1 %v6392_v31  ;;  %v6472_v13 = vld [vmem:[#allocation3 + $0x2b0] ss:$20 sps:$4 sm:$0xff]   ;;  %v6476_v31 = vld [vmem:[#allocation3 + $0x38] ss:$20 sps:$4 sm:$0xff]  }
 0x11a   :  { %2501 = vmatpush1.bf16.msra.mxu0 %v6387_v32  ;;  %2544 = vmatpush1.bf16.msra.mxu1 %v6390_v33  ;;  %v6479_v32 = vld [vmem:[#allocation3 + $0x2dc] ss:$20 sps:$4 sm:$0xff]   ;;  %v6481_v33 = vld [vmem:[#allocation3 + $0x60] ss:$20 sps:$4 sm:$0xff]  }
 0x11b   :  { %2502 = vmatprep.subr.bf16.mxu0 %v6395_v35  ;;  %2545 = vmatprep.subr.bf16.mxu1 %v6398_v36  ;;  %v6484_v35 = vld [vmem:[#allocation3 + $0x304] ss:$20 sps:$4 sm:$0xff]   ;;  %v6485_v36 = vld [vmem:[#allocation3 + $0x1c8] ss:$20 sps:$4 sm:$0xff]  }
 0x11e   :  { %2503 = vmatpush1.bf16.msra.mxu0 %v6393_v37  ;;  %2546 = vmatpush1.bf16.msra.mxu1 %v6396_v38  ;;  %v6482_v37 = vld [vmem:[#allocation3 + $0x300] ss:$20 sps:$4 sm:$0xff]   ;;  %v6486_v38 = vld [vmem:[#allocation3 + $0x88] ss:$20 sps:$4 sm:$0xff]  }
 0x11f   :  { %2504 = vmatprep.subr.bf16.mxu0 %v6401_v39  ;;  %2547 = vmatprep.subr.bf16.mxu1 %v6404_v40  ;;  %v6489_v39 = vld [vmem:[#allocation3 + $0x32c] ss:$20 sps:$4 sm:$0xff]   ;;  %v6490_v40 = vld [vmem:[#allocation3 + $0x1f0] ss:$20 sps:$4 sm:$0xff]  }
 0x122   :  { %2505 = vmatpush1.bf16.msra.mxu0 %v6399_v41  ;;  %2548 = vmatpush1.bf16.msra.mxu1 %v6402_v42  ;;  %v6487_v41 = vld [vmem:[#allocation3 + $0x328] ss:$20 sps:$4 sm:$0xff]  }
 0x123   :  { %2506 = vmatprep.subr.bf16.mxu0 %v6407_v43  ;;  %2549 = vmatprep.subr.bf16.mxu1 %v6410_v44  ;;  %v6494_v42 = vld [vmem:[#allocation3 + $0x354] ss:$20 sps:$4 sm:$0xff]   ;;  %v6495_v43 = vld [vmem:[#allocation3 + $0x218] ss:$20 sps:$4 sm:$0xff]   ;;  %v6492_v44 = vld [vmem:[#allocation3 + $0x350] ss:$20 sps:$4 sm:$0xff]  }
 0x126   :  { %2507 = vmatpush1.bf16.msra.mxu0 %v6405_v45  ;;  %2550 = vmatpush1.bf16.msra.mxu1 %v6408_v46  ;;  %v6496_v45 = vld [vmem:[#allocation3 + $0xd8] ss:$20 sps:$4 sm:$0xff]   ;;  %v6499_v46 = vld [vmem:[#allocation3 + $0x37c] ss:$20 sps:$4 sm:$0xff]  }
 0x127   :  { %2508 = vmatprep.subr.bf16.mxu0 %v6413_v47  ;;  %2551 = vmatprep.subr.bf16.mxu1 %v6416_v48  ;;  %v6500_v47 = vld [vmem:[#allocation3 + $0x240] ss:$20 sps:$4 sm:$0xff]   ;;  %v6497_v48 = vld [vmem:[#allocation3 + $0x378] ss:$20 sps:$4 sm:$0xff]  }
 0x12a   :  { %2509 = vmatpush1.bf16.msra.mxu0 %v6411_v49  ;;  %2552 = vmatpush1.bf16.msra.mxu1 %v6414_v50  ;;  %v6501_v49 = vld [vmem:[#allocation3 + $0x100] ss:$20 sps:$4 sm:$0xff]   ;;  %v6504_v50 = vld [vmem:[#allocation3 + $0x3a4] ss:$20 sps:$4 sm:$0xff]  }
 0x12b   :  { %2510 = vmatprep.subr.bf16.mxu0 %v6419_v52  ;;  %2553 = vmatprep.subr.bf16.mxu1 %v6422_v53  ;;  %v6505_v52 = vld [vmem:[#allocation3 + $0x268] ss:$20 sps:$4 sm:$0xff]  }
 0x12c   :  { %v6931_v53 = vld [vmem:[%s7399_s1] sm:$0xff] }
 0x12e   :  { %2511 = vmatpush1.bf16.msra.mxu0 %v6417_v54  ;;  %2554 = vmatpush1.bf16.msra.mxu1 %v6420_v55  ;;  %v6932_v54 = vld [vmem:[%s7398_s0] sm:$0xff] }
 0x12f   :  { %2512 = vmatprep.subr.bf16.mxu0 %v6425_v56  ;;  %2555 = vmatprep.subr.bf16.mxu1 %v6428_v57  ;;  %v101_v55 = vsub.bf16 %v6932_v54, %v6931_v53  ;;  %v6933_v56 = vld [vmem:[%s7399_s1 + $0x10] sm:$0xff] }
 0x130   :  { %v6934_v57 = vld [vmem:[%s7398_s0 + $0x10] sm:$0xff] }
 0x131   :  { %v6579_v53 = vld [vmem:[#allocation3 + $0x330] ss:$20 sps:$4 sm:$0xff]   ;;  %v6580_v54 = vld [vmem:[#allocation3 + $0x498] ss:$20 sps:$4 sm:$0xff]  }
 0x132   :  { %2513 = vmatpush1.bf16.msra.mxu0 %v6423_v58  ;;  %2556 = vmatpush1.bf16.msra.mxu1 %v6426_v59  ;;  %v103_v58 = vsub.bf16 %v6934_v57, %v6933_v56  ;;  %v6502_v59 = vld [vmem:[#allocation3 + $0x3a0] ss:$20 sps:$4 sm:$0xff]   ;;  %v6584_v56 = vld [vmem:[#allocation3 + $0x358] ss:$20 sps:$4 sm:$0xff]  }
 0x133   :  { %2514 = vmatprep.subr.bf16.mxu0 %v6431_v60  ;;  %2557 = vmatprep.subr.bf16.mxu1 %v6434_v6  ;;  %v6506_v60 = vld [vmem:[#allocation3 + $0x128] ss:$20 sps:$4 sm:$0xff]   ;;  %v6509_v6 = vld [vmem:[#allocation3 + $0x3cc] ss:$20 sps:$4 sm:$0xff]  }
 0x134   :  { %v6585_v57 = vld [vmem:[#allocation3 + $0x4c0] ss:$20 sps:$4 sm:$0xff]  }
 0x136   :  { %2515 = vmatpush1.bf16.msra.mxu0 %v6429_v61  ;;  %2558 = vmatpush1.bf16.msra.mxu1 %v6432_v62  ;;  %v6512_v61 = vld [vmem:[#allocation7 + $0x4] ss:$20 sps:$4 sm:$0xff]   ;;  %v7269_v62 = vand.u32 2147450879, %v101_v55  ;;  %v6581_v55 = vld [vmem:[#allocation7 + $0x208] ss:$20 sps:$4 sm:$0xff]  }
 0x137   :  { %2516 = vmatprep.subr.bf16.mxu0 %v6437_v63  ;;  %2559 = vmatprep.subr.bf16.mxu1 %v6440_v0  ;;  %v7271_v63 = vand.u32 2147450879, %v103_v58  ;;  %v6507_v0 = vld [vmem:[#allocation3 + $0x3c8] ss:$20 sps:$4 sm:$0xff]  }
 0x138   :  { %v6588_v58 = vld [vmem:[#allocation7 + $0x234] ss:$20 sps:$4 sm:$0xff]  }
 0x13a   :  { %2517 = vmatpush1.bf16.msra.mxu0 %v6435_v34  ;;  %2560 = vmatpush1.bf16.msra.mxu1 %v6438_v1  ;;  %v6510_v34 = vld [vmem:[#allocation7] ss:$20 sps:$4 sm:$0xff]  }
 0x13b   :  { %2518 = vmatprep.subr.bf16.mxu0 %v6443_v2  ;;  %2561 = vmatprep.subr.bf16.mxu1 %v6446_v3  ;;  %v6515_v1 = vld [vmem:[#allocation3 + $0x3f4] ss:$20 sps:$4 sm:$0xff]   ;;  %v6518_v2 = vld [vmem:[#allocation7 + $0x2c] ss:$20 sps:$4 sm:$0xff]   ;;  %v7275_v3 = vcombine.high %v7269_v62, %v7271_v63 }
 0x13e   :  { %2519 = vmatpush1.bf16.msra.mxu0 %v6441_v4  ;;  %2562 = vmatpush1.bf16.msra.mxu1 %v6444_v5  ;;  %v6513_v4 = vld [vmem:[#allocation3 + $0x3f0] ss:$20 sps:$4 sm:$0xff]   ;;  %v6516_v5 = vld [vmem:[#allocation7 + $0x28] ss:$20 sps:$4 sm:$0xff]  }
 0x13f   :  { %2520 = vmatprep.subr.bf16.mxu0 %v6449_v7  ;;  %2563 = vmatprep.subr.bf16.mxu1 %v6452_v8  ;;  %v6521_v7 = vld [vmem:[#allocation3 + $0x41c] ss:$20 sps:$4 sm:$0xff]   ;;  %v6524_v8 = vld [vmem:[#allocation7 + $0x54] ss:$20 sps:$4 sm:$0xff]  }
 0x142   :  { %2521 = vmatpush1.bf16.msra.mxu0 %v6447_v9  ;;  %2564 = vmatpush1.bf16.msra.mxu1 %v6450_v10  ;;  %v6519_v9 = vld [vmem:[#allocation3 + $0x418] ss:$20 sps:$4 sm:$0xff]   ;;  %v6522_v10 = vld [vmem:[#allocation7 + $0x50] ss:$20 sps:$4 sm:$0xff]  }
 0x143   :  { %2522 = vmatprep.subr.bf16.mxu0 %v6455_v11  ;;  %2565 = vmatprep.subr.bf16.mxu1 %v6458_v12  ;;  %v6527_v11 = vld [vmem:[#allocation3 + $0x444] ss:$20 sps:$4 sm:$0xff]   ;;  %v6530_v12 = vld [vmem:[#allocation7 + $0x7c] ss:$20 sps:$4 sm:$0xff]  }
 0x146   :  { %2523 = vmatpush1.bf16.msra.mxu0 %v6453_v14  ;;  %2566 = vmatpush1.bf16.msra.mxu1 %v6456_v15  ;;  %v6525_v14 = vld [vmem:[#allocation3 + $0x440] ss:$20 sps:$4 sm:$0xff]  }
 0x147   :  { %2524 = vmatprep.subr.bf16.mxu0 %v6461_v16  ;;  %2567 = vmatprep.subr.bf16.mxu1 %v6464_v17  ;;  %v6533_v15 = vld [vmem:[#allocation3 + $0x46c] ss:$20 sps:$4 sm:$0xff]   ;;  %v6536_v16 = vld [vmem:[#allocation7 + $0xa4] ss:$20 sps:$4 sm:$0xff]   ;;  %v6531_v17 = vld [vmem:[#allocation3 + $0x468] ss:$20 sps:$4 sm:$0xff]  }
 0x14a   :  { %2525 = vmatpush1.bf16.msra.mxu0 %v6459_v18  ;;  %2568 = vmatpush1.bf16.msra.mxu1 %v6462_v22  ;;  %v6534_v18 = vld [vmem:[#allocation7 + $0xa0] ss:$20 sps:$4 sm:$0xff]  }
 0x14b   :  { %2580 = vmatprep.subr.bf16.mxu1 %v6468_v23  ;;  %5867 = vmatprep.subr.bf16.mxu0 %v6469_v24  ;;  %v6539_v22 = vld [vmem:[#allocation3 + $0x494] ss:$20 sps:$4 sm:$0xff]   ;;  %v6542_v23 = vld [vmem:[#allocation7 + $0xcc] ss:$20 sps:$4 sm:$0xff]   ;;  %v6537_v24 = vld [vmem:[#allocation3 + $0x490] ss:$20 sps:$4 sm:$0xff]  }
 0x14d   :  { %2527 = vmatmul.mubr.bf16.vlgmr.msra.gmra.mrb[0].mxu0 %v7251_v27  ;;  %2570 = vmatmul.mubr.bf16.vlgmr.msra.gmra.mrb[0].mxu1 %v7229_v19 }
 0x14e   :  { %2581 = vmatpush1.bf16.msra.mxu1 %v6466_v26  ;;  %5868 = vmatpush3.bf16.msra.mxu0 %v6471_v51  ;;  %v6540_v26 = vld [vmem:[#allocation7 + $0xc8] ss:$20 sps:$4 sm:$0xff]  }
 0x14f   :  { %2582 = vmatprep.subr.bf16.mxu1 %v6474_v28  ;;  %5869 = vmatprep.subr.bf16.mxu0 %v6475_v29  ;;  %v6545_v51 = vld [vmem:[#allocation3 + $0x4bc] ss:$20 sps:$4 sm:$0xff]   ;;  %v6548_v28 = vld [vmem:[#allocation7 + $0xf4] ss:$20 sps:$4 sm:$0xff]   ;;  %v6543_v29 = vld [vmem:[#allocation3 + $0x4b8] ss:$20 sps:$4 sm:$0xff]  }
 0x150   :  { %2655 = vmatprep.mubr.bf16.mxu0 %v7222_v30  ;;  %2612 = vmatprep.mubr.bf16.mxu1 %v7243_v25  ;;  %v6491_v30 = vld [vmem:[#allocation3 + $0xb0] ss:$20 sps:$4 sm:$0xff]  }
 0x152   :  { %2583 = vmatpush1.bf16.msra.mxu1 %v6472_v13  ;;  %5870 = vmatpush3.bf16.msra.mxu0 %v6476_v31  ;;  %v6546_v13 = vld [vmem:[#allocation7 + $0xf0] ss:$20 sps:$4 sm:$0xff]  }
 0x153   :  { %2584 = vmatprep.subr.bf16.mxu1 %v6479_v32  ;;  %5871 = vmatprep.subr.bf16.mxu0 %v6480_v20  ;;  %v6551_v31 = vld [vmem:[#allocation3 + $0x4e4] ss:$20 sps:$4 sm:$0xff]   ;;  %v6554_v32 = vld [vmem:[#allocation7 + $0x11c] ss:$20 sps:$4 sm:$0xff]   ;;  %v6549_v20 = vld [vmem:[#allocation3 + $0x4e0] ss:$20 sps:$4 sm:$0xff]  }
 0x156   :  { %2585 = vmatpush1.bf16.msra.mxu1 %v6477_v21  ;;  %5872 = vmatpush3.bf16.msra.mxu0 %v6481_v33  ;;  %v6552_v21 = vld [vmem:[#allocation7 + $0x118] ss:$20 sps:$4 sm:$0xff]   ;;  %v6555_v33 = vld [vmem:[#allocation3 + $0x3d0] ss:$20 sps:$4 sm:$0xff]  }
 0x157   :  { %2586 = vmatprep.subr.bf16.mxu1 %v6484_v35  ;;  %5873 = vmatprep.subr.bf16.mxu0 %v6485_v36  ;;  %v6558_v35 = vld [vmem:[#allocation7 + $0x144] ss:$20 sps:$4 sm:$0xff]   ;;  %v6556_v36 = vld [vmem:[#allocation7 + $0x140] ss:$20 sps:$4 sm:$0xff]  }
 0x15a   :  { %2587 = vmatpush1.bf16.msra.mxu1 %v6482_v37  ;;  %5874 = vmatpush3.bf16.msra.mxu0 %v6486_v38  ;;  %v6559_v37 = vld [vmem:[#allocation3 + $0x290] ss:$20 sps:$4 sm:$0xff]   ;;  %v6560_v38 = vld [vmem:[#allocation3 + $0x3f8] ss:$20 sps:$4 sm:$0xff]  }
 0x15b   :  { %2588 = vmatprep.subr.bf16.mxu1 %v6489_v39  ;;  %5875 = vmatprep.subr.bf16.mxu0 %v6490_v40  ;;  %v6563_v39 = vld [vmem:[#allocation7 + $0x16c] ss:$20 sps:$4 sm:$0xff]   ;;  %v6561_v40 = vld [vmem:[#allocation7 + $0x168] ss:$20 sps:$4 sm:$0xff]  }
 0x15e   :  { %2589 = vmatpush1.bf16.msra.mxu1 %v6487_v41  ;;  %5876 = vmatpush3.bf16.msra.mxu0 %v6491_v30  ;;  %v6564_v41 = vld [vmem:[#allocation3 + $0x2b8] ss:$20 sps:$4 sm:$0xff]   ;;  %v6565_v30 = vld [vmem:[#allocation3 + $0x420] ss:$20 sps:$4 sm:$0xff]  }
 0x15f   :  { %2590 = vmatprep.subr.bf16.mxu1 %v6494_v42  ;;  %5877 = vmatprep.subr.bf16.mxu0 %v6495_v43  ;;  %v6568_v42 = vld [vmem:[#allocation7 + $0x194] ss:$20 sps:$4 sm:$0xff]   ;;  %v6566_v43 = vld [vmem:[#allocation7 + $0x190] ss:$20 sps:$4 sm:$0xff]  }
 0x162   :  { %2591 = vmatpush1.bf16.msra.mxu1 %v6492_v44  ;;  %5878 = vmatpush3.bf16.msra.mxu0 %v6496_v45  ;;  %v6569_v44 = vld [vmem:[#allocation3 + $0x2e0] ss:$20 sps:$4 sm:$0xff]   ;;  %v6570_v45 = vld [vmem:[#allocation3 + $0x448] ss:$20 sps:$4 sm:$0xff]  }
 0x163   :  { %2592 = vmatprep.subr.bf16.mxu1 %v6499_v46  ;;  %5879 = vmatprep.subr.bf16.mxu0 %v6500_v47  ;;  %v6573_v46 = vld [vmem:[#allocation7 + $0x1bc] ss:$20 sps:$4 sm:$0xff]   ;;  %v6571_v47 = vld [vmem:[#allocation7 + $0x1b8] ss:$20 sps:$4 sm:$0xff]  }
 0x166   :  { %2593 = vmatpush1.bf16.msra.mxu1 %v6497_v48  ;;  %5880 = vmatpush3.bf16.msra.mxu0 %v6501_v49  ;;  %v6574_v48 = vld [vmem:[#allocation3 + $0x308] ss:$20 sps:$4 sm:$0xff]   ;;  %v6575_v49 = vld [vmem:[#allocation3 + $0x470] ss:$20 sps:$4 sm:$0xff]  }
 0x167   :  { %2594 = vmatprep.subr.bf16.mxu1 %v6504_v50  ;;  %5881 = vmatprep.subr.bf16.mxu0 %v6505_v52  ;;  %v6578_v50 = vld [vmem:[#allocation7 + $0x1e4] ss:$20 sps:$4 sm:$0xff]   ;;  %v6576_v52 = vld [vmem:[#allocation7 + $0x1e0] ss:$20 sps:$4 sm:$0xff]  }
 0x16a   :  { %2595 = vmatpush1.bf16.msra.mxu1 %v6502_v59  ;;  %5882 = vmatpush3.bf16.msra.mxu0 %v6506_v60  ;;  %v6586_v59 = vld [vmem:[#allocation7 + $0x230] ss:$20 sps:$4 sm:$0xff]   ;;  %v6589_v60 = vld [vmem:[#allocation3 + $0x380] ss:$20 sps:$4 sm:$0xff]  }
 0x16b   :  { %2596 = vmatprep.subr.bf16.mxu1 %v6509_v6  ;;  %3749 = vmatprep.subr.bf16.mxu0 %v6512_v61  ;;  %v6590_v6 = vld [vmem:[#allocation3 + $0x4e8] ss:$20 sps:$4 sm:$0xff]  }
 0x16c   :  { %v6593_v61 = vld [vmem:[#allocation7 + $0x25c] ss:$20 sps:$4 sm:$0xff]  }
 0x16d   :  { %2656 = vmatmul.mubr.bf16.vlgmr.msra.gmra.mrb[4].mxu0 %v7229_v19  ;;  %v6528_v19 = vld [vmem:[#allocation7 + $0x78] ss:$20 sps:$4 sm:$0xff]  }
 0x16e   :  { %2597 = vmatpush1.bf16.msra.mxu1 %v6507_v0  ;;  %3750 = vmatpush1.bf16.msra.mxu0 %v6510_v34  ;;  %v6935_v0 = vld [vmem:[%s7399_s1 + $0x8] sm:$0xff] }
 0x16f   :  { %2598 = vmatprep.subr.bf16.mxu1 %v6515_v1  ;;  %3751 = vmatprep.subr.bf16.mxu0 %v6518_v2  ;;  %v6936_v34 = vld [vmem:[%s7398_s0 + $0x8] sm:$0xff] }
 0x170   :  { %3781 = vmatprep.mubr.bf16.mxu0 %v7275_v3  ;;  %v102_v1 = vsub.bf16 %v6936_v34, %v6935_v0  ;;  %v6591_v2 = vld [vmem:[#allocation7 + $0x258] ss:$20 sps:$4 sm:$0xff]  }
 0x171   :  { %v6666_v0 = vld [vmem:[#allocation7 + $0x1c4] ss:$20 sps:$4 sm:$0xff]  }
 0x172   :  { %2599 = vmatpush1.bf16.msra.mxu1 %v6513_v4  ;;  %3752 = vmatpush1.bf16.msra.mxu0 %v6516_v5  ;;  %v6594_v4 = vld [vmem:[#allocation3 + $0x3a8] ss:$20 sps:$4 sm:$0xff]   ;;  %v6661_v34 = vld [vmem:[#allocation7 + $0x438] ss:$20 sps:$4 sm:$0xff]  }
 0x173   :  { %2600 = vmatprep.subr.bf16.mxu1 %v6521_v7  ;;  %3753 = vmatprep.subr.bf16.mxu0 %v6524_v8  ;;  %v6937_v5 = vld [vmem:[%s7399_s1 + $0x18] sm:$0xff] }
 0x174   :  { %v6938_v7 = vld [vmem:[%s7398_s0 + $0x18] sm:$0xff] }
 0x175   :  { %v104_v8 = vsub.bf16 %v6938_v7, %v6937_v5  ;;  %v6667_v5 = vld [vmem:[#allocation7 + $0x460] ss:$20 sps:$4 sm:$0xff]   ;;  %v6670_v7 = vld [vmem:[#allocation7 + $0x1e8] ss:$20 sps:$4 sm:$0xff]  }
 0x176   :  { %2601 = vmatpush1.bf16.msra.mxu1 %v6519_v9  ;;  %3754 = vmatpush1.bf16.msra.mxu0 %v6522_v10  ;;  %v6597_v9 = vld [vmem:[#allocation7 + $0x284] ss:$20 sps:$4 sm:$0xff]   ;;  %v6600_v10 = vld [vmem:[#allocation7 + $0xc] ss:$20 sps:$4 sm:$0xff]  }
 0x177   :  { %2602 = vmatprep.subr.bf16.mxu1 %v6527_v11  ;;  %3755 = vmatprep.subr.bf16.mxu0 %v6530_v12  ;;  %v7293_v11 = vand.u32 2147450879, %v102_v1  ;;  %v6595_v12 = vld [vmem:[#allocation7 + $0x280] ss:$20 sps:$4 sm:$0xff]  }
 0x178   :  { %v6664_v1 = vld [vmem:[#allocation7 + $0x1c0] ss:$20 sps:$4 sm:$0xff]  }
 0x17a   :  { %2603 = vmatpush1.bf16.msra.mxu1 %v6525_v14  ;;  %3756 = vmatpush1.bf16.msra.mxu0 %v6528_v19  ;;  %v6598_v14 = vld [vmem:[#allocation7 + $0x8] ss:$20 sps:$4 sm:$0xff]   ;;  %v7295_v19 = vand.u32 2147450879, %v104_v8  ;;  %v6675_v8 = vld [vmem:[#allocation7 + $0x48c] ss:$20 sps:$4 sm:$0xff]  }
 0x17b   :  { %2604 = vmatprep.subr.bf16.mxu1 %v6533_v15  ;;  %3757 = vmatprep.subr.bf16.mxu0 %v6536_v16  ;;  %v7299_v15 = vcombine.low %v7269_v62, %v7271_v63  ;;  %v6603_v16 = vld [vmem:[#allocation7 + $0x2ac] ss:$20 sps:$4 sm:$0xff]   ;;  %v6609_v62 = vld [vmem:[#allocation7 + $0x2d4] ss:$20 sps:$4 sm:$0xff]   ;;  %v6612_v63 = vld [vmem:[#allocation7 + $0x5c] ss:$20 sps:$4 sm:$0xff]  }
 0x17e   :  { %2605 = vmatpush1.bf16.msra.mxu1 %v6531_v17  ;;  %3758 = vmatpush1.bf16.msra.mxu0 %v6534_v18  ;;  %v6606_v17 = vld [vmem:[#allocation7 + $0x34] ss:$20 sps:$4 sm:$0xff]   ;;  %v7303_v18 = vcombine.high %v7293_v11, %v7295_v19 }
 0x17f   :  { %2606 = vmatprep.subr.bf16.mxu1 %v6539_v22  ;;  %3759 = vmatprep.subr.bf16.mxu0 %v6542_v23  ;;  %v6601_v22 = vld [vmem:[#allocation7 + $0x2a8] ss:$20 sps:$4 sm:$0xff]   ;;  %v6604_v23 = vld [vmem:[#allocation7 + $0x30] ss:$20 sps:$4 sm:$0xff]  }
 0x182   :  { %2607 = vmatpush1.bf16.msra.mxu1 %v6537_v24  ;;  %3760 = vmatpush1.bf16.msra.mxu0 %v6540_v26  ;;  %v6607_v24 = vld [vmem:[#allocation7 + $0x2d0] ss:$20 sps:$4 sm:$0xff]   ;;  %v6610_v26 = vld [vmem:[#allocation7 + $0x58] ss:$20 sps:$4 sm:$0xff]  }
 0x183   :  { %2608 = vmatprep.subr.bf16.mxu1 %v6545_v51  ;;  %3761 = vmatprep.subr.bf16.mxu0 %v6548_v28  ;;  %v6618_v51 = vld [vmem:[#allocation7 + $0x84] ss:$20 sps:$4 sm:$0xff]  }
 0x184   :  { %v6613_v28 = vld [vmem:[#allocation7 + $0x2f8] ss:$20 sps:$4 sm:$0xff]  }
 0x186   :  { %2609 = vmatpush1.bf16.msra.mxu1 %v6543_v29  ;;  %3762 = vmatpush1.bf16.msra.mxu0 %v6546_v13  ;;  %v6616_v29 = vld [vmem:[#allocation7 + $0x80] ss:$20 sps:$4 sm:$0xff]   ;;  %v6621_v13 = vld [vmem:[#allocation7 + $0x324] ss:$20 sps:$4 sm:$0xff]  }
 0x187   :  { %2610 = vmatprep.subr.bf16.mxu1 %v6551_v31  ;;  %3763 = vmatprep.subr.bf16.mxu0 %v6554_v32  ;;  %v6624_v31 = vld [vmem:[#allocation7 + $0xac] ss:$20 sps:$4 sm:$0xff]  }
 0x188   :  { %v6619_v32 = vld [vmem:[#allocation7 + $0x320] ss:$20 sps:$4 sm:$0xff]  }
 0x18a   :  { %2611 = vmatpush1.bf16.msra.mxu1 %v6549_v20  ;;  %3764 = vmatpush1.bf16.msra.mxu0 %v6552_v21  ;;  %v6622_v20 = vld [vmem:[#allocation7 + $0xa8] ss:$20 sps:$4 sm:$0xff]   ;;  %v6627_v21 = vld [vmem:[#allocation7 + $0x34c] ss:$20 sps:$4 sm:$0xff]  }
 0x18b   :  { %5889 = vmatprep.subr.bf16.mxu1 %v6555_v33  ;;  %3765 = vmatprep.subr.bf16.mxu0 %v6558_v35  ;;  %v6630_v33 = vld [vmem:[#allocation7 + $0xd4] ss:$20 sps:$4 sm:$0xff]  }
 0x18c   :  { %v6625_v35 = vld [vmem:[#allocation7 + $0x348] ss:$20 sps:$4 sm:$0xff]  }
 0x18d   :  { %2613 = vmatmul.mubr.bf16.vlgmr.msra.gmra.mrb[0].mxu1 %v7251_v27 }
 0x18e   :  { %5890 = vmatpush3.bf16.msra.mxu1 %v6559_v37  ;;  %3766 = vmatpush1.bf16.msra.mxu0 %v6556_v36  ;;  %v6628_v36 = vld [vmem:[#allocation7 + $0xd0] ss:$20 sps:$4 sm:$0xff]   ;;  %v6633_v37 = vld [vmem:[#allocation7 + $0x374] ss:$20 sps:$4 sm:$0xff]  }
 0x18f   :  { %5891 = vmatprep.subr.bf16.mxu1 %v6560_v38  ;;  %3767 = vmatprep.subr.bf16.mxu0 %v6563_v39  ;;  %v6636_v38 = vld [vmem:[#allocation7 + $0xfc] ss:$20 sps:$4 sm:$0xff]  }
 0x190   :  { %2696 = vmatprep.mubr.bf16.mxu1 %v7243_v25  ;;  %v6583_v25 = vld [vmem:[#allocation7 + $0x20c] ss:$20 sps:$4 sm:$0xff]  }
 0x192   :  { %5892 = vmatpush3.bf16.msra.mxu1 %v6564_v41  ;;  %3768 = vmatpush1.bf16.msra.mxu0 %v6561_v40  ;;  %v6631_v40 = vld [vmem:[#allocation7 + $0x370] ss:$20 sps:$4 sm:$0xff]   ;;  %v6634_v41 = vld [vmem:[#allocation7 + $0xf8] ss:$20 sps:$4 sm:$0xff]  }
 0x193   :  { %5893 = vmatprep.subr.bf16.mxu1 %v6565_v30  ;;  %3769 = vmatprep.subr.bf16.mxu0 %v6568_v42  ;;  %v6639_v42 = vld [vmem:[#allocation7 + $0x39c] ss:$20 sps:$4 sm:$0xff]  }
 0x196   :  { %5894 = vmatpush3.bf16.msra.mxu1 %v6569_v44  ;;  %3770 = vmatpush1.bf16.msra.mxu0 %v6566_v43 }
 0x197   :  { %5895 = vmatprep.subr.bf16.mxu1 %v6570_v45  ;;  %3771 = vmatprep.subr.bf16.mxu0 %v6573_v46  ;;  %v6642_v46 = vld [vmem:[#allocation7 + $0x124] ss:$20 sps:$4 sm:$0xff]  }
 0x19a   :  { %5896 = vmatpush3.bf16.msra.mxu1 %v6574_v48  ;;  %3772 = vmatpush1.bf16.msra.mxu0 %v6571_v47  ;;  %v6637_v48 = vld [vmem:[#allocation7 + $0x398] ss:$20 sps:$4 sm:$0xff]  }
 0x19b   :  { %5897 = vmatprep.subr.bf16.mxu1 %v6575_v49  ;;  %3773 = vmatprep.subr.bf16.mxu0 %v6578_v50  ;;  %v6640_v49 = vld [vmem:[#allocation7 + $0x120] ss:$20 sps:$4 sm:$0xff]   ;;  %v6645_v50 = vld [vmem:[#allocation7 + $0x3c4] ss:$20 sps:$4 sm:$0xff]  }
 0x19e   :  { %5898 = vmatpush3.bf16.msra.mxu1 %v6579_v53  ;;  %3774 = vmatpush1.bf16.msra.mxu0 %v6576_v52  ;;  %v6648_v52 = vld [vmem:[#allocation7 + $0x14c] ss:$20 sps:$4 sm:$0xff]  }
 0x19f   :  { %5899 = vmatprep.subr.bf16.mxu1 %v6580_v54  ;;  %3775 = vmatprep.subr.bf16.mxu0 %v6583_v25  ;;  %v6643_v53 = vld [vmem:[#allocation7 + $0x3c0] ss:$20 sps:$4 sm:$0xff]   ;;  %v6646_v54 = vld [vmem:[#allocation7 + $0x148] ss:$20 sps:$4 sm:$0xff]  }
 0x1a0   :  { %v6651_v25 = vld [vmem:[#allocation7 + $0x3ec] ss:$20 sps:$4 sm:$0xff]  }
 0x1a2   :  { %5900 = vmatpush3.bf16.msra.mxu1 %v6584_v56  ;;  %3776 = vmatpush1.bf16.msra.mxu0 %v6581_v55  ;;  %v6654_v55 = vld [vmem:[#allocation7 + $0x174] ss:$20 sps:$4 sm:$0xff]  }
 0x1a3   :  { %5901 = vmatprep.subr.bf16.mxu1 %v6585_v57  ;;  %3777 = vmatprep.subr.bf16.mxu0 %v6588_v58  ;;  %v6649_v56 = vld [vmem:[#allocation7 + $0x3e8] ss:$20 sps:$4 sm:$0xff]   ;;  %v6652_v57 = vld [vmem:[#allocation7 + $0x170] ss:$20 sps:$4 sm:$0xff]  }
 0x1a4   :  { %v6657_v58 = vld [vmem:[#allocation7 + $0x414] ss:$20 sps:$4 sm:$0xff]  }
 0x1a6   :  { %5902 = vmatpush3.bf16.msra.mxu1 %v6589_v60  ;;  %3778 = vmatpush1.bf16.msra.mxu0 %v6586_v59  ;;  %v6660_v59 = vld [vmem:[#allocation7 + $0x19c] ss:$20 sps:$4 sm:$0xff]  }
 0x1a7   :  { %5903 = vmatprep.subr.bf16.mxu1 %v6590_v6  ;;  %3779 = vmatprep.subr.bf16.mxu0 %v6593_v61  ;;  %v6655_v60 = vld [vmem:[#allocation7 + $0x410] ss:$20 sps:$4 sm:$0xff]   ;;  %v6658_v6 = vld [vmem:[#allocation7 + $0x198] ss:$20 sps:$4 sm:$0xff]  }
 0x1a8   :  { %v6663_v61 = vld [vmem:[#allocation7 + $0x43c] ss:$20 sps:$4 sm:$0xff]  }
 0x1aa   :  { %5904 = vmatpush3.bf16.msra.mxu1 %v6594_v4  ;;  %3780 = vmatpush1.bf16.msra.mxu0 %v6591_v2  ;;  %v6669_v2 = vld [vmem:[#allocation7 + $0x464] ss:$20 sps:$4 sm:$0xff]   ;;  %v6672_v4 = vld [vmem:[#allocation7 + $0x1ec] ss:$20 sps:$4 sm:$0xff]  }
 0x1ab   :  { %3792 = vmatprep.subr.bf16.mxu0 %v6597_v9  ;;  %3835 = vmatprep.subr.bf16.mxu1 %v6600_v10  ;;  %v6678_v9 = vld [vmem:[#allocation7 + $0x214] ss:$20 sps:$4 sm:$0xff]  }
 0x1ac   :  { %v6673_v10 = vld [vmem:[#allocation7 + $0x488] ss:$20 sps:$4 sm:$0xff]  }
 0x1ad   :  { %2697 = vmatmul.mubr.bf16.vlgmr.msra.gmra.mrb[12].mxu1 %v7251_v27  ;;  %3782 = vmatmul.mubr.bf16.vlgmr.msra.gmra.mrb[0].mxu0 %v7299_v15  ;;  %v6615_v27 = vld [vmem:[#allocation7 + $0x2fc] ss:$20 sps:$4 sm:$0xff]  }
 0x1ae   :  { %3793 = vmatpush1.bf16.msra.mxu0 %v6595_v12  ;;  %3836 = vmatpush1.bf16.msra.mxu1 %v6598_v14  ;;  %v6676_v12 = vld [vmem:[#allocation7 + $0x210] ss:$20 sps:$4 sm:$0xff]   ;;  %v6681_v14 = vld [vmem:[#allocation7 + $0x4b4] ss:$20 sps:$4 sm:$0xff]  }
 0x1af   :  { %3794 = vmatprep.subr.bf16.mxu0 %v6603_v16  ;;  %3837 = vmatprep.subr.bf16.mxu1 %v6606_v17  ;;  %v6684_v16 = vld [vmem:[#allocation7 + $0x23c] ss:$20 sps:$4 sm:$0xff]  }
 0x1b0   :  { %3824 = vmatprep.mubr.bf16.mxu0 %v7303_v18  ;;  %3867 = vmatprep.mubr.bf16.mxu1 %v7275_v3 }
 0x1b2   :  { %3795 = vmatpush1.bf16.msra.mxu0 %v6601_v22  ;;  %3838 = vmatpush1.bf16.msra.mxu1 %v6604_v23 }
 0x1b3   :  { %3796 = vmatprep.subr.bf16.mxu0 %v6609_v62  ;;  %3839 = vmatprep.subr.bf16.mxu1 %v6612_v63  ;;  %v6679_v63 = vld [vmem:[#allocation7 + $0x4b0] ss:$20 sps:$4 sm:$0xff]  }
 0x1b6   :  { %3797 = vmatpush1.bf16.msra.mxu0 %v6607_v24  ;;  %3840 = vmatpush1.bf16.msra.mxu1 %v6610_v26  ;;  %v6682_v24 = vld [vmem:[#allocation7 + $0x238] ss:$20 sps:$4 sm:$0xff]  }
 0x1b7   :  { %3798 = vmatprep.subr.bf16.mxu0 %v6615_v27  ;;  %3841 = vmatprep.subr.bf16.mxu1 %v6618_v51  ;;  %v6687_v27 = vld [vmem:[#allocation7 + $0x4dc] ss:$20 sps:$4 sm:$0xff]   ;;  %v6690_v51 = vld [vmem:[#allocation7 + $0x264] ss:$20 sps:$4 sm:$0xff]  }
 0x1ba   :  { %3799 = vmatpush1.bf16.msra.mxu0 %v6613_v28  ;;  %3842 = vmatpush1.bf16.msra.mxu1 %v6616_v29 }
 0x1bb   :  { %3800 = vmatprep.subr.bf16.mxu0 %v6621_v13  ;;  %3843 = vmatprep.subr.bf16.mxu1 %v6624_v31  ;;  %v6685_v31 = vld [vmem:[#allocation7 + $0x4d8] ss:$20 sps:$4 sm:$0xff]  }
 0x1be   :  { %3801 = vmatpush1.bf16.msra.mxu0 %v6619_v32  ;;  %3844 = vmatpush1.bf16.msra.mxu1 %v6622_v20  ;;  %v6688_v32 = vld [vmem:[#allocation7 + $0x260] ss:$20 sps:$4 sm:$0xff]  }
 0x1bf   :  { %3802 = vmatprep.subr.bf16.mxu0 %v6627_v21  ;;  %3845 = vmatprep.subr.bf16.mxu1 %v6630_v33  ;;  %v6693_v20 = vld [vmem:[#allocation7 + $0x28c] ss:$20 sps:$4 sm:$0xff]   ;;  %v6739_v21 = vld [vmem:[#allocation7 + $0x150] ss:$20 sps:$4 sm:$0xff]   ;;  %v7321_v33 = vcombine.low %v7293_v11, %v7295_v19 }
 0x1c0   :  { %v5839_v39 = vpop.f32.mrb[4].mxu1  ;;  %v6746_v11 = vld [vmem:[#allocation7 + $0x1a0] ss:$20 sps:$4 sm:$0xff]   ;;  %v6697_v19 = vld [vmem:[#allocation7 + $0x2d8] ss:$20 sps:$4 sm:$0xff]  }
 0x1c1   :  { %v5840_v30 = vpop.f32.mrb[5].mxu1 }
 0x1c2   :  { %v7309_v43 = vadd.f32 %v5840_v30, %v5839_v39  ;;  %v5842_v44 = vpop.f32.mrb[6].mxu1  ;;  %3803 = vmatpush1.bf16.msra.mxu0 %v6625_v35  ;;  %3846 = vmatpush1.bf16.msra.mxu1 %v6628_v36  ;;  %v6691_v35 = vld [vmem:[#allocation7 + $0x288] ss:$20 sps:$4 sm:$0xff]   ;;  %v6740_v36 = vld [vmem:[#allocation7 + $0x10] ss:$20 sps:$4 sm:$0xff]  }
 0x1c3   :  { %v5843_v45 = vpop.f32.mrb[7].mxu1  ;;  %3804 = vmatprep.subr.bf16.mxu0 %v6633_v37  ;;  %3847 = vmatprep.subr.bf16.mxu1 %v6636_v38  ;;  %v6696_v37 = vld [vmem:[#allocation7 + $0x2b4] ss:$20 sps:$4 sm:$0xff]   ;;  %v6742_v38 = vld [vmem:[#allocation7 + $0x178] ss:$20 sps:$4 sm:$0xff]  }
 0x1c4   :  { %v7311_v47 = vadd.f32 %v5843_v45, %v5842_v44  ;;  %v6694_v39 = vld [vmem:[#allocation7 + $0x2b0] ss:$20 sps:$4 sm:$0xff]   ;;  %v6748_v30 = vld [vmem:[#allocation7 + $0x60] ss:$20 sps:$4 sm:$0xff]   ;;  %v6752_v45 = vld [vmem:[#allocation7 + $0x88] ss:$20 sps:$4 sm:$0xff]  }
 0x1c5   :  { %v6700_v44 = vld [vmem:[#allocation7 + $0x300] ss:$20 sps:$4 sm:$0xff]  }
 0x1c6   :  { %3805 = vmatpush1.bf16.msra.mxu0 %v6631_v40  ;;  %3848 = vmatpush1.bf16.msra.mxu1 %v6634_v41  ;;  %v6744_v40 = vld [vmem:[#allocation7 + $0x38] ss:$20 sps:$4 sm:$0xff]   ;;  %v6699_v41 = vld [vmem:[#allocation7 + $0x2dc] ss:$20 sps:$4 sm:$0xff]  }
 0x1c7   :  { %3806 = vmatprep.subr.bf16.mxu0 %v6639_v42  ;;  %3849 = vmatprep.subr.bf16.mxu1 %v6642_v46  ;;  %v6702_v42 = vld [vmem:[#allocation7 + $0x304] ss:$20 sps:$4 sm:$0xff]   ;;  %v6705_v46 = vld [vmem:[#allocation7 + $0x32c] ss:$20 sps:$4 sm:$0xff]  }
 0x1ca   :  { %3807 = vmatpush1.bf16.msra.mxu0 %v6637_v48  ;;  %3850 = vmatpush1.bf16.msra.mxu1 %v6640_v49  ;;  %v6703_v48 = vld [vmem:[#allocation7 + $0x328] ss:$20 sps:$4 sm:$0xff]  }
 0x1cb   :  { %3808 = vmatprep.subr.bf16.mxu0 %v6645_v50  ;;  %3851 = vmatprep.subr.bf16.mxu1 %v6648_v52  ;;  %v6708_v49 = vld [vmem:[#allocation7 + $0x354] ss:$20 sps:$4 sm:$0xff]   ;;  %v6758_v50 = vld [vmem:[#allocation7 + $0x218] ss:$20 sps:$4 sm:$0xff]   ;;  %v6706_v52 = vld [vmem:[#allocation7 + $0x350] ss:$20 sps:$4 sm:$0xff]  }
 0x1ce   :  { %3809 = vmatpush1.bf16.msra.mxu0 %v6643_v53  ;;  %3852 = vmatpush1.bf16.msra.mxu1 %v6646_v54  ;;  %v6760_v53 = vld [vmem:[#allocation7 + $0xd8] ss:$20 sps:$4 sm:$0xff]   ;;  %v6711_v54 = vld [vmem:[#allocation7 + $0x37c] ss:$20 sps:$4 sm:$0xff]  }
 0x1cf   :  { %3810 = vmatprep.subr.bf16.mxu0 %v6651_v25  ;;  %3853 = vmatprep.subr.bf16.mxu1 %v6654_v55  ;;  %v6762_v25 = vld [vmem:[#allocation7 + $0x240] ss:$20 sps:$4 sm:$0xff]   ;;  %v6709_v55 = vld [vmem:[#allocation7 + $0x378] ss:$20 sps:$4 sm:$0xff]  }
 0x1d2   :  { %3811 = vmatpush1.bf16.msra.mxu0 %v6649_v56  ;;  %3854 = vmatpush1.bf16.msra.mxu1 %v6652_v57  ;;  %v6764_v56 = vld [vmem:[#allocation7 + $0x100] ss:$20 sps:$4 sm:$0xff]   ;;  %v6714_v57 = vld [vmem:[#allocation7 + $0x3a4] ss:$20 sps:$4 sm:$0xff]  }
 0x1d3   :  { %3812 = vmatprep.subr.bf16.mxu0 %v6657_v58  ;;  %3855 = vmatprep.subr.bf16.mxu1 %v6660_v59  ;;  %v6766_v58 = vld [vmem:[#allocation7 + $0x268] ss:$20 sps:$4 sm:$0xff]   ;;  %v6712_v59 = vld [vmem:[#allocation7 + $0x3a0] ss:$20 sps:$4 sm:$0xff]  }
 0x1d6   :  { %3813 = vmatpush1.bf16.msra.mxu0 %v6655_v60  ;;  %3856 = vmatpush1.bf16.msra.mxu1 %v6658_v6  ;;  %v6768_v60 = vld [vmem:[#allocation7 + $0x128] ss:$20 sps:$4 sm:$0xff]   ;;  %v6717_v6 = vld [vmem:[#allocation7 + $0x3cc] ss:$20 sps:$4 sm:$0xff]  }
 0x1d7   :  { %3814 = vmatprep.subr.bf16.mxu0 %v6663_v61  ;;  %3857 = vmatprep.subr.bf16.mxu1 %v6666_v0  ;;  %v6773_v61 = vld [vmem:[#allocation8 + $0x4] ss:$12 sps:$4 sm:$0xff]   ;;  %v6715_v0 = vld [vmem:[#allocation7 + $0x3c8] ss:$20 sps:$4 sm:$0xff]  }
 0x1da   :  { %3815 = vmatpush1.bf16.msra.mxu0 %v6661_v34  ;;  %3858 = vmatpush1.bf16.msra.mxu1 %v6664_v1  ;;  %v6771_v34 = vld [vmem:[#allocation8] ss:$12 sps:$4 sm:$0xff]   ;;  %v6720_v1 = vld [vmem:[#allocation7 + $0x3f4] ss:$20 sps:$4 sm:$0xff]  }
 0x1db   :  { %3816 = vmatprep.subr.bf16.mxu0 %v6669_v2  ;;  %3859 = vmatprep.subr.bf16.mxu1 %v6672_v4  ;;  %v6776_v2 = vld [vmem:[#allocation8 + $0x1c] ss:$12 sps:$4 sm:$0xff]   ;;  %v6718_v4 = vld [vmem:[#allocation7 + $0x3f0] ss:$20 sps:$4 sm:$0xff]  }
 0x1de   :  { %3817 = vmatpush1.bf16.msra.mxu0 %v6667_v5  ;;  %3860 = vmatpush1.bf16.msra.mxu1 %v6670_v7  ;;  %v6774_v5 = vld [vmem:[#allocation8 + $0x18] ss:$12 sps:$4 sm:$0xff]   ;;  %v6723_v7 = vld [vmem:[#allocation7 + $0x41c] ss:$20 sps:$4 sm:$0xff]  }
 0x1df   :  { %3818 = vmatprep.subr.bf16.mxu0 %v6675_v8  ;;  %3861 = vmatprep.subr.bf16.mxu1 %v6678_v9  ;;  %v6779_v8 = vld [vmem:[#allocation8 + $0x34] ss:$12 sps:$4 sm:$0xff]   ;;  %v6721_v9 = vld [vmem:[#allocation7 + $0x418] ss:$20 sps:$4 sm:$0xff]  }
 0x1e0   :  { %v5861_v17 = vpop.f32.mrb[8].mxu1 }
 0x1e1   :  { %v5862_v22 = vpop.f32.mrb[9].mxu1 }
 0x1e2   :  { %v5863_v23 = vadd.f32 %v5862_v22, %v5861_v17  ;;  %v5864_v62 = vpop.f32.mrb[10].mxu1  ;;  %3819 = vmatpush1.bf16.msra.mxu0 %v6673_v10  ;;  %3862 = vmatpush1.bf16.msra.mxu1 %v6676_v12  ;;  %v6777_v10 = vld [vmem:[#allocation8 + $0x30] ss:$12 sps:$4 sm:$0xff]   ;;  %v6726_v12 = vld [vmem:[#allocation7 + $0x444] ss:$20 sps:$4 sm:$0xff]  }
 0x1e3   :  { %v5865_v26 = vpop.f32.mrb[11].mxu1  ;;  %3820 = vmatprep.subr.bf16.mxu0 %v6681_v14  ;;  %3863 = vmatprep.subr.bf16.mxu1 %v6684_v16  ;;  %v6782_v14 = vld [vmem:[#allocation8 + $0x4c] ss:$12 sps:$4 sm:$0xff]   ;;  %v6724_v16 = vld [vmem:[#allocation7 + $0x440] ss:$20 sps:$4 sm:$0xff]  }
 0x1e4   :  { %v7314_v28 = vadd.f32 %v5863_v23, %v7309_v43  ;;  %v5866_v29 = vadd.f32 %v5865_v26, %v5864_v62  ;;  %v6750_v43 = vld [vmem:[#allocation7 + $0x1c8] ss:$20 sps:$4 sm:$0xff]   ;;  %v6729_v17 = vld [vmem:[#allocation7 + $0x46c] ss:$20 sps:$4 sm:$0xff]   ;;  %v6785_v22 = vld [vmem:[#allocation8 + $0x64] ss:$12 sps:$4 sm:$0xff]  }
 0x1e5   :  { %v6727_v23 = vld [vmem:[#allocation7 + $0x468] ss:$20 sps:$4 sm:$0xff]   ;;  %v6783_v62 = vld [vmem:[#allocation8 + $0x60] ss:$12 sps:$4 sm:$0xff]   ;;  %v6730_v26 = vld [vmem:[#allocation7 + $0x490] ss:$20 sps:$4 sm:$0xff]  }
 0x1e6   :  { %v7317_v13 = vadd.f32 %v5866_v29, %v7311_v47  ;;  %3821 = vmatpush1.bf16.msra.mxu0 %v6679_v63  ;;  %3864 = vmatpush1.bf16.msra.mxu1 %v6682_v24  ;;  %v6754_v47 = vld [vmem:[#allocation7 + $0x1f0] ss:$20 sps:$4 sm:$0xff]   ;;  %v6732_v63 = vld [vmem:[#allocation7 + $0x494] ss:$20 sps:$4 sm:$0xff]  }
 0x1e7   :  { %3822 = vmatprep.subr.bf16.mxu0 %v6687_v27  ;;  %3865 = vmatprep.subr.bf16.mxu1 %v6690_v51  ;;  %v6788_v24 = vld [vmem:[#allocation8 + $0x7c] ss:$12 sps:$4 sm:$0xff]   ;;  %v6786_v27 = vld [vmem:[#allocation8 + $0x78] ss:$12 sps:$4 sm:$0xff]   ;;  %v6791_v29 = vld [vmem:[#allocation8 + $0x94] ss:$12 sps:$4 sm:$0xff]  }
 0x1e8   :  { %v6735_v51 = vld [vmem:[#allocation7 + $0x4bc] ss:$20 sps:$4 sm:$0xff]  }
 0x1ea   :  { %3823 = vmatpush1.bf16.msra.mxu0 %v6685_v31  ;;  %3866 = vmatpush1.bf16.msra.mxu1 %v6688_v32  ;;  %v6733_v31 = vld [vmem:[#allocation7 + $0x4b8] ss:$20 sps:$4 sm:$0xff]   ;;  %v6789_v32 = vld [vmem:[#allocation8 + $0x90] ss:$12 sps:$4 sm:$0xff]  }
 0x1eb   :  { %3878 = vmatprep.subr.bf16.mxu1 %v6693_v20  ;;  %5911 = vmatprep.subr.bf16.mxu0 %v6739_v21  ;;  %v6738_v20 = vld [vmem:[#allocation7 + $0x4e4] ss:$20 sps:$4 sm:$0xff]  }
 0x1ec   :  { %v6794_v21 = vld [vmem:[#allocation8 + $0xac] ss:$12 sps:$4 sm:$0xff]  }
 0x1ed   :  { %3825 = vmatmul.mubr.bf16.vlgmr.msra.gmra.mrb[0].mxu0 %v7321_v33  ;;  %3868 = vmatmul.mubr.bf16.vlgmr.msra.gmra.mrb[0].mxu1 %v7299_v15 }
 0x1ee   :  { %3879 = vmatpush1.bf16.msra.mxu1 %v6691_v35  ;;  %5912 = vmatpush3.bf16.msra.mxu0 %v6740_v36  ;;  %v6736_v35 = vld [vmem:[#allocation7 + $0x4e0] ss:$20 sps:$4 sm:$0xff]  }
 0x1ef   :  { %3880 = vmatprep.subr.bf16.mxu1 %v6696_v37  ;;  %3910 = vmatprep.mubr.bf16.mxu1 %v7303_v18  ;;  %v6792_v36 = vld [vmem:[#allocation8 + $0xa8] ss:$12 sps:$4 sm:$0xff]   ;;  %v6741_v37 = vld [vmem:[#allocation7 + $0x3d0] ss:$20 sps:$4 sm:$0xff]  }
 0x1f0   :  { %5913 = vmatprep.subr.bf16.mxu0 %v6742_v38  ;;  %3953 = vmatprep.mubr.bf16.mxu0 %v7275_v3  ;;  %v6756_v3 = vld [vmem:[#allocation7 + $0xb0] ss:$20 sps:$4 sm:$0xff]  }
 0x1f1   :  { %v6797_v38 = vld [vmem:[#allocation8 + $0xc4] ss:$12 sps:$4 sm:$0xff]  }
 0x1f2   :  { %3881 = vmatpush1.bf16.msra.mxu1 %v6694_v39  ;;  %5914 = vmatpush3.bf16.msra.mxu0 %v6744_v40  ;;  %v6743_v39 = vld [vmem:[#allocation7 + $0x290] ss:$20 sps:$4 sm:$0xff]   ;;  %v6745_v40 = vld [vmem:[#allocation7 + $0x3f8] ss:$20 sps:$4 sm:$0xff]  }
 0x1f3   :  { %3882 = vmatprep.subr.bf16.mxu1 %v6699_v41  ;;  %5915 = vmatprep.subr.bf16.mxu0 %v6746_v11  ;;  %v6795_v41 = vld [vmem:[#allocation8 + $0xc0] ss:$12 sps:$4 sm:$0xff]   ;;  %v6802_v11 = vld [vmem:[#allocation8 + $0xdc] ss:$12 sps:$4 sm:$0xff]  }
 0x1f6   :  { %3883 = vmatpush1.bf16.msra.mxu1 %v6697_v19  ;;  %5916 = vmatpush3.bf16.msra.mxu0 %v6748_v30  ;;  %v6747_v19 = vld [vmem:[#allocation7 + $0x2b8] ss:$20 sps:$4 sm:$0xff]   ;;  %v6749_v30 = vld [vmem:[#allocation7 + $0x420] ss:$20 sps:$4 sm:$0xff]  }
 0x1f7   :  { %3884 = vmatprep.subr.bf16.mxu1 %v6702_v42  ;;  %5917 = vmatprep.subr.bf16.mxu0 %v6750_v43  ;;  %v6800_v42 = vld [vmem:[#allocation8 + $0xd8] ss:$12 sps:$4 sm:$0xff]   ;;  %v6807_v43 = vld [vmem:[#allocation8 + $0xf4] ss:$12 sps:$4 sm:$0xff]  }
 0x1fa   :  { %3885 = vmatpush1.bf16.msra.mxu1 %v6700_v44  ;;  %5918 = vmatpush3.bf16.msra.mxu0 %v6752_v45  ;;  %v6751_v44 = vld [vmem:[#allocation7 + $0x2e0] ss:$20 sps:$4 sm:$0xff]   ;;  %v6753_v45 = vld [vmem:[#allocation7 + $0x448] ss:$20 sps:$4 sm:$0xff]  }
 0x1fb   :  { %3886 = vmatprep.subr.bf16.mxu1 %v6705_v46  ;;  %5919 = vmatprep.subr.bf16.mxu0 %v6754_v47  ;;  %v6805_v46 = vld [vmem:[#allocation8 + $0xf0] ss:$12 sps:$4 sm:$0xff]   ;;  %v6812_v47 = vld [vmem:[#allocation8 + $0x10c] ss:$12 sps:$4 sm:$0xff]  }
 0x1fe   :  { %3887 = vmatpush1.bf16.msra.mxu1 %v6703_v48  ;;  %5920 = vmatpush3.bf16.msra.mxu0 %v6756_v3  ;;  %v6755_v48 = vld [vmem:[#allocation7 + $0x308] ss:$20 sps:$4 sm:$0xff]   ;;  %v6757_v3 = vld [vmem:[#allocation7 + $0x470] ss:$20 sps:$4 sm:$0xff]  }
 0x1ff   :  { %3888 = vmatprep.subr.bf16.mxu1 %v6708_v49  ;;  %5921 = vmatprep.subr.bf16.mxu0 %v6758_v50  ;;  %v6817_v49 = vld [vmem:[#allocation8 + $0x124] ss:$12 sps:$4 sm:$0xff]  }
 0x200   :  { %v6759_v50 = vld [vmem:[#allocation7 + $0x330] ss:$20 sps:$4 sm:$0xff]  }
 0x202   :  { %3889 = vmatpush1.bf16.msra.mxu1 %v6706_v52  ;;  %5922 = vmatpush3.bf16.msra.mxu0 %v6760_v53  ;;  %v6761_v52 = vld [vmem:[#allocation7 + $0x498] ss:$20 sps:$4 sm:$0xff]  }
 0x203   :  { %3890 = vmatprep.subr.bf16.mxu1 %v6711_v54  ;;  %5923 = vmatprep.subr.bf16.mxu0 %v6762_v25  ;;  %v6815_v53 = vld [vmem:[#allocation8 + $0x120] ss:$12 sps:$4 sm:$0xff]   ;;  %v6822_v25 = vld [vmem:[#allocation8 + $0x13c] ss:$12 sps:$4 sm:$0xff]  }
 0x204   :  { %v6763_v54 = vld [vmem:[#allocation7 + $0x358] ss:$20 sps:$4 sm:$0xff]  }
 0x206   :  { %3891 = vmatpush1.bf16.msra.mxu1 %v6709_v55  ;;  %5924 = vmatpush3.bf16.msra.mxu0 %v6764_v56  ;;  %v6765_v55 = vld [vmem:[#allocation7 + $0x4c0] ss:$20 sps:$4 sm:$0xff]   ;;  %v6820_v56 = vld [vmem:[#allocation8 + $0x138] ss:$12 sps:$4 sm:$0xff]  }
 0x207   :  { %3892 = vmatprep.subr.bf16.mxu1 %v6714_v57  ;;  %5925 = vmatprep.subr.bf16.mxu0 %v6766_v58 }
 0x20a   :  { %3893 = vmatpush1.bf16.msra.mxu1 %v6712_v59  ;;  %5926 = vmatpush3.bf16.msra.mxu0 %v6768_v60 }
 0x20b   :  { %3894 = vmatprep.subr.bf16.mxu1 %v6717_v6  ;;  %4902 = vmatprep.subr.bf16.mxu0 %v6773_v61  ;;  %v6767_v6 = vld [vmem:[#allocation7 + $0x380] ss:$20 sps:$4 sm:$0xff]  }
 0x20c   :  { %v6827_v61 = vld [vmem:[#allocation8 + $0x154] ss:$12 sps:$4 sm:$0xff]  }
 0x20d   :  { %3954 = vmatmul.mubr.bf16.vlgmr.msra.gmra.mrb[8].mxu0 %v7299_v15  ;;  %v6780_v15 = vld [vmem:[#allocation8 + $0x48] ss:$12 sps:$4 sm:$0xff]  }
 0x20e   :  { %3895 = vmatpush1.bf16.msra.mxu1 %v6715_v0  ;;  %4903 = vmatpush1.bf16.msra.mxu0 %v6771_v34  ;;  %v6769_v34 = vld [vmem:[#allocation7 + $0x4e8] ss:$20 sps:$4 sm:$0xff]  }
 0x20f   :  { %3896 = vmatprep.subr.bf16.mxu1 %v6720_v1  ;;  %4904 = vmatprep.subr.bf16.mxu0 %v6776_v2  ;;  %v6825_v1 = vld [vmem:[#allocation8 + $0x150] ss:$12 sps:$4 sm:$0xff]  }
 0x212   :  { %3897 = vmatpush1.bf16.msra.mxu1 %v6718_v4  ;;  %4905 = vmatpush1.bf16.msra.mxu0 %v6774_v5 }
 0x213   :  { %3898 = vmatprep.subr.bf16.mxu1 %v6723_v7  ;;  %4906 = vmatprep.subr.bf16.mxu0 %v6779_v8  ;;  %v6770_v7 = vld [vmem:[#allocation7 + $0x3a8] ss:$20 sps:$4 sm:$0xff]   ;;  %v6832_v8 = vld [vmem:[#allocation8 + $0x16c] ss:$12 sps:$4 sm:$0xff]  }
 0x216   :  { %3899 = vmatpush1.bf16.msra.mxu1 %v6721_v9  ;;  %4907 = vmatpush1.bf16.msra.mxu0 %v6777_v10  ;;  %v6798_v9 = vld [vmem:[#allocation8 + $0xc8] ss:$12 sps:$4 sm:$0xff]  }
 0x217   :  { %3900 = vmatprep.subr.bf16.mxu1 %v6726_v12  ;;  %4908 = vmatprep.subr.bf16.mxu0 %v6782_v14  ;;  %v6830_v10 = vld [vmem:[#allocation8 + $0x168] ss:$12 sps:$4 sm:$0xff]   ;;  %v6837_v14 = vld [vmem:[#allocation8 + $0x184] ss:$12 sps:$4 sm:$0xff]  }
 0x218   :  { %v6799_v12 = vld [vmem:[#allocation8 + $0x8] ss:$12 sps:$4 sm:$0xff]  }
 0x21a   :  { %3901 = vmatpush1.bf16.msra.mxu1 %v6724_v16  ;;  %4909 = vmatpush1.bf16.msra.mxu0 %v6780_v15  ;;  %v6803_v16 = vld [vmem:[#allocation8 + $0xe0] ss:$12 sps:$4 sm:$0xff]   ;;  %v6809_v15 = vld [vmem:[#allocation8 + $0x38] ss:$12 sps:$4 sm:$0xff]  }
 0x21b   :  { %3902 = vmatprep.subr.bf16.mxu1 %v6729_v17  ;;  %4910 = vmatprep.subr.bf16.mxu0 %v6785_v22  ;;  %v6813_v17 = vld [vmem:[#allocation8 + $0x110] ss:$12 sps:$4 sm:$0xff]  }
 0x21c   :  { %v6814_v22 = vld [vmem:[#allocation8 + $0x50] ss:$12 sps:$4 sm:$0xff]  }
 0x21e   :  { %3903 = vmatpush1.bf16.msra.mxu1 %v6727_v23  ;;  %4911 = vmatpush1.bf16.msra.mxu0 %v6783_v62  ;;  %v6818_v23 = vld [vmem:[#allocation8 + $0x128] ss:$12 sps:$4 sm:$0xff]  }
 0x21f   :  { %3904 = vmatprep.subr.bf16.mxu1 %v6732_v63  ;;  %4912 = vmatprep.subr.bf16.mxu0 %v6788_v24  ;;  %v6819_v62 = vld [vmem:[#allocation8 + $0x68] ss:$12 sps:$4 sm:$0xff]   ;;  %v6823_v63 = vld [vmem:[#allocation8 + $0x140] ss:$12 sps:$4 sm:$0xff]  }
 0x220   :  { %v6824_v24 = vld [vmem:[#allocation8 + $0x80] ss:$12 sps:$4 sm:$0xff]  }
 0x222   :  { %3905 = vmatpush1.bf16.msra.mxu1 %v6730_v26  ;;  %4913 = vmatpush1.bf16.msra.mxu0 %v6786_v27  ;;  %v6829_v26 = vld [vmem:[#allocation8 + $0x98] ss:$12 sps:$4 sm:$0xff]   ;;  %v6833_v27 = vld [vmem:[#allocation8 + $0x170] ss:$12 sps:$4 sm:$0xff]  }
 0x223   :  { %3906 = vmatprep.subr.bf16.mxu1 %v6735_v51  ;;  %4914 = vmatprep.subr.bf16.mxu0 %v6791_v29  ;;  %v6834_v51 = vld [vmem:[#allocation8 + $0xb0] ss:$12 sps:$4 sm:$0xff]   ;;  %v6862_v29 = vld [vmem:[#allocation8 + $0x248] ss:$12 sps:$4 sm:$0xff]  }
 0x226   :  { %3907 = vmatpush1.bf16.msra.mxu1 %v6733_v31  ;;  %4915 = vmatpush1.bf16.msra.mxu0 %v6789_v32 }
 0x227   :  { %3908 = vmatprep.subr.bf16.mxu1 %v6738_v20  ;;  %4916 = vmatprep.subr.bf16.mxu0 %v6794_v21 }
 0x22a   :  { %3909 = vmatpush1.bf16.msra.mxu1 %v6736_v35  ;;  %4917 = vmatpush1.bf16.msra.mxu0 %v6792_v36 }
 0x22b   :  { %5933 = vmatprep.subr.bf16.mxu1 %v6741_v37  ;;  %4918 = vmatprep.subr.bf16.mxu0 %v6797_v38 }
 0x22d   :  { %3911 = vmatmul.mubr.bf16.vlgmr.msra.gmra.mrb[0].mxu1 %v7321_v33 }
 0x22e   :  { %5934 = vmatpush3.bf16.msra.mxu1 %v6743_v39  ;;  %3994 = vmatprep.mubr.bf16.mxu1 %v7303_v18  ;;  %v6810_v18 = vld [vmem:[#allocation8 + $0x108] ss:$12 sps:$4 sm:$0xff]   ;;  %v4015_v39 = vlaneseq }
 0x22f   :  { %5935 = vmatprep.subr.bf16.mxu1 %v6745_v40  ;;  %4919 = vmatpush1.bf16.msra.mxu0 %v6795_v41 }
 0x230   :  { %4920 = vmatprep.subr.bf16.mxu0 %v6802_v11  ;;  %v7337_v40 = vshrl.u32 %v4015_v39, 7  ;;  %v7345_v11 = vld [vmem:[%s7403_s5] sm:$0x1f] }
 0x231   :  { %v6859_v39 = vld [vmem:[#allocation8 + $0x240] ss:$12 sps:$4 sm:$0xff]  }
 0x232   :  { %5936 = vmatpush3.bf16.msra.mxu1 %v6747_v19  ;;  %v7340_v41 = vsub.s32 0, %v7337_v40  ;;  %v7348_v19 = vsub.s32 1, %v7337_v40 }
 0x233   :  { %5937 = vmatprep.subr.bf16.mxu1 %v6749_v30  ;;  %4921 = vmatpush1.bf16.msra.mxu0 %v6800_v42 }
 0x234   :  { %4922 = vmatprep.subr.bf16.mxu0 %v6807_v43  ;;  %v4018_v30 = vrot.slane %v7345_v11, %v7340_v41  ;;  %v4022_v42 = vrot.slane %v7345_v11, %v7348_v19 }
 0x236   :  { %5938 = vmatpush3.bf16.msra.mxu1 %v6751_v44 }
 0x237   :  { %5939 = vmatprep.subr.bf16.mxu1 %v6753_v45  ;;  %4923 = vmatpush1.bf16.msra.mxu0 %v6805_v46 }
 0x238   :  { %4924 = vmatprep.subr.bf16.mxu0 %v6812_v47 }
 0x23a   :  { %5940 = vmatpush3.bf16.msra.mxu1 %v6755_v48 }
 0x23b   :  { %5941 = vmatprep.subr.bf16.mxu1 %v6757_v3  ;;  %4925 = vmatpush1.bf16.msra.mxu0 %v6810_v18 }
 0x23c   :  { %4926 = vmatprep.subr.bf16.mxu0 %v6817_v49 }
 0x23e   :  { %5942 = vmatpush3.bf16.msra.mxu1 %v6759_v50 }
 0x23f   :  { %5943 = vmatprep.subr.bf16.mxu1 %v6761_v52  ;;  %4927 = vmatpush1.bf16.msra.mxu0 %v6815_v53 }
 0x240   :  { %v5883_v57 = vpop.f32.mrb[4].mxu0  ;;  %4928 = vmatprep.subr.bf16.mxu0 %v6822_v25 }
 0x241   :  { %v5884_v58 = vpop.f32.mrb[5].mxu0 }
 0x242   :  { %v5885_v59 = vadd.f32 %v5884_v58, %v5883_v57  ;;  %v5886_v60 = vpop.f32.mrb[6].mxu0  ;;  %5944 = vmatpush3.bf16.msra.mxu1 %v6763_v54 }
 0x243   :  { %v5887_v0 = vpop.f32.mrb[7].mxu0  ;;  %5945 = vmatprep.subr.bf16.mxu1 %v6765_v55  ;;  %4929 = vmatpush1.bf16.msra.mxu0 %v6820_v56 }
 0x244   :  { %v2658_v2 = vadd.f32 %v5885_v59, %v7314_v28  ;;  %v5888_v4 = vadd.f32 %v5887_v0, %v5886_v60  ;;  %4930 = vmatprep.subr.bf16.mxu0 %v6827_v61  ;;  %v6804_v28 = vld [vmem:[#allocation8 + $0x20] ss:$12 sps:$4 sm:$0xff]   ;;  %v6863_v60 = vld [vmem:[#allocation8 + $0x188] ss:$12 sps:$4 sm:$0xff]   ;;  %v6838_v0 = vld [vmem:[#allocation8 + $0x198] ss:$12 sps:$4 sm:$0xff]  }
 0x245   :  { %v6835_v59 = vld [vmem:[#allocation8 + $0x180] ss:$12 sps:$4 sm:$0xff]  }
 0x246   :  { %v2661_v5 = vadd.f32 %v5888_v4, %v7317_v13  ;;  %5946 = vmatpush3.bf16.msra.mxu1 %v6767_v6  ;;  %v6808_v13 = vld [vmem:[#allocation8 + $0xf8] ss:$12 sps:$4 sm:$0xff]   ;;  %v6840_v6 = vld [vmem:[#allocation8 + $0x19c] ss:$12 sps:$4 sm:$0xff]   ;;  %v6867_v61 = vld [vmem:[#allocation8 + $0x260] ss:$12 sps:$4 sm:$0xff]  }
 0x247   :  { %5947 = vmatprep.subr.bf16.mxu1 %v6769_v34  ;;  %4931 = vmatpush1.bf16.msra.mxu0 %v6825_v1  ;;  %v6868_v34 = vld [vmem:[#allocation8 + $0x1a0] ss:$12 sps:$4 sm:$0xff]   ;;  %v6841_v4 = vld [vmem:[#allocation8 + $0x1b0] ss:$12 sps:$4 sm:$0xff]  }
 0x248   :  { %4932 = vmatprep.subr.bf16.mxu0 %v6832_v8  ;;  %v6843_v1 = vld [vmem:[#allocation8 + $0x1b4] ss:$12 sps:$4 sm:$0xff]   ;;  %v6877_v8 = vld [vmem:[#allocation8 + $0x290] ss:$12 sps:$4 sm:$0xff]  }
 0x24a   :  { %5948 = vmatpush3.bf16.msra.mxu1 %v6770_v7  ;;  %v6846_v7 = vld [vmem:[#allocation8 + $0x1cc] ss:$12 sps:$4 sm:$0xff]  }
 0x24b   :  { %5955 = vmatprep.subr.bf16.mxu1 %v6798_v9  ;;  %4933 = vmatpush1.bf16.msra.mxu0 %v6830_v10  ;;  %v6844_v9 = vld [vmem:[#allocation8 + $0x1c8] ss:$12 sps:$4 sm:$0xff]   ;;  %v6878_v10 = vld [vmem:[#allocation8 + $0x1d0] ss:$12 sps:$4 sm:$0xff]  }
 0x24c   :  { %4945 = vmatprep.subr.bf16.mxu0 %v6837_v14  ;;  %v6882_v14 = vld [vmem:[#allocation8 + $0x2a8] ss:$12 sps:$4 sm:$0xff]  }
 0x24d   :  { %3995 = vmatmul.mubr.bf16.vlgmr.msra.gmra.mrb[16].mxu1 %v7321_v33  ;;  %v6828_v33 = vld [vmem:[#allocation8 + $0x158] ss:$12 sps:$4 sm:$0xff]  }
 0x24e   :  { %5956 = vmatpush3.bf16.msra.mxu1 %v6799_v12  ;;  %v6849_v12 = vld [vmem:[#allocation8 + $0x1e4] ss:$12 sps:$4 sm:$0xff]  }
 0x24f   :  { %5957 = vmatprep.subr.bf16.mxu1 %v6803_v16  ;;  %v6847_v16 = vld [vmem:[#allocation8 + $0x1e0] ss:$12 sps:$4 sm:$0xff]  }
 0x252   :  { %5958 = vmatpush3.bf16.msra.mxu1 %v6804_v28  ;;  %v6883_v28 = vld [vmem:[#allocation8 + $0x1e8] ss:$12 sps:$4 sm:$0xff]  }
 0x253   :  { %5959 = vmatprep.subr.bf16.mxu1 %v6808_v13  ;;  %v6852_v13 = vld [vmem:[#allocation8 + $0x1fc] ss:$12 sps:$4 sm:$0xff]  }
 0x256   :  { %5960 = vmatpush3.bf16.msra.mxu1 %v6809_v15  ;;  %v6887_v15 = vld [vmem:[#allocation8 + $0x2c0] ss:$12 sps:$4 sm:$0xff]  }
 0x257   :  { %5961 = vmatprep.subr.bf16.mxu1 %v6813_v17  ;;  %v6850_v17 = vld [vmem:[#allocation8 + $0x1f8] ss:$12 sps:$4 sm:$0xff]  }
 0x25a   :  { %5962 = vmatpush3.bf16.msra.mxu1 %v6814_v22  ;;  %v6888_v22 = vld [vmem:[#allocation8 + $0x200] ss:$12 sps:$4 sm:$0xff]  }
 0x25b   :  { %5963 = vmatprep.subr.bf16.mxu1 %v6818_v23  ;;  %v6855_v23 = vld [vmem:[#allocation8 + $0x214] ss:$12 sps:$4 sm:$0xff]  }
 0x25e   :  { %5964 = vmatpush3.bf16.msra.mxu1 %v6819_v62  ;;  %v6892_v62 = vld [vmem:[#allocation8 + $0x2d8] ss:$12 sps:$4 sm:$0xff]  }
 0x25f   :  { %5965 = vmatprep.subr.bf16.mxu1 %v6823_v63 }
 0x262   :  { %5966 = vmatpush3.bf16.msra.mxu1 %v6824_v24  ;;  %v6853_v24 = vld [vmem:[#allocation8 + $0x210] ss:$12 sps:$4 sm:$0xff]  }
 0x263   :  { %5967 = vmatprep.subr.bf16.mxu1 %v6828_v33  ;;  %v6893_v33 = vld [vmem:[#allocation8 + $0x218] ss:$12 sps:$4 sm:$0xff]  }
 0x266   :  { %5968 = vmatpush3.bf16.msra.mxu1 %v6829_v26 }
 0x267   :  { %5969 = vmatprep.subr.bf16.mxu1 %v6833_v27  ;;  %v6858_v27 = vld [vmem:[#allocation8 + $0x22c] ss:$12 sps:$4 sm:$0xff]  }
 0x26a   :  { %5970 = vmatpush3.bf16.msra.mxu1 %v6834_v51  ;;  %v6897_v51 = vld [vmem:[#allocation8 + $0x2f0] ss:$12 sps:$4 sm:$0xff]  }
 0x26b   :  { %5977 = vmatprep.subr.bf16.mxu1 %v6862_v29 }
 0x280   :  { %v5905_v31 = vpop.f32.mrb[12].mxu1 }
 0x281   :  { %v5906_v32 = vpop.f32.mrb[13].mxu1 }
 0x282   :  { %v5907_v20 = vadd.f32 %v5906_v32, %v5905_v31  ;;  %v5908_v21 = vpop.f32.mrb[14].mxu1 }
 0x283   :  { %v5909_v35 = vpop.f32.mrb[15].mxu1 }
 0x284   :  { %v7333_v36 = vadd.f32 %v5907_v20, %v2658_v2  ;;  %v5910_v37 = vadd.f32 %v5909_v35, %v5908_v21  ;;  %v6872_v2 = vld [vmem:[#allocation8 + $0x278] ss:$12 sps:$4 sm:$0xff]   ;;  %v6856_v21 = vld [vmem:[#allocation8 + $0x228] ss:$12 sps:$4 sm:$0xff]   ;;  %v6898_v35 = vld [vmem:[#allocation8 + $0x230] ss:$12 sps:$4 sm:$0xff]  }
 0x286   :  { %v7335_v38 = vadd.f32 %v5910_v37, %v2661_v5  ;;  %v6873_v5 = vld [vmem:[#allocation8 + $0x1b8] ss:$12 sps:$4 sm:$0xff]  }
 0x287   :  { %v6861_v37 = vld [vmem:[#allocation8 + $0x244] ss:$12 sps:$4 sm:$0xff]  }
 0x2c0   :  { %v3826_v43 = vpop.f32.mrb[0].mxu0 }
 0x2c1   :  { %v4040_v44 = vadd.f32 %v4018_v30, %v3826_v43  ;;  %v3828_v45 = vpop.f32.mrb[1].mxu0  ;;  %v6864_v43 = vld [vmem:[#allocation8 + $0x258] ss:$12 sps:$4 sm:$0xff]  }
 0x2c2   :  { %v4041_v46 = vadd.f32 %v4022_v42, %v3828_v45  ;;  %v3830_v47 = vpop.f32.mrb[2].mxu0  ;;  %v6869_v45 = vld [vmem:[#allocation8 + $0x270] ss:$12 sps:$4 sm:$0xff]  }
 0x2c3   :  { %v4060_v48 = vmul.f32 0.01, %v4040_v44  ;;  %v4045_v3 = vadd.f32 %v4018_v30, %v3830_v47  ;;  %v3832_v18 = vpop.f32.mrb[3].mxu0  ;;  %vm4050_vm0 = vcmp.ge.f32.partialorder %v4040_v44, 0.0  ;;  %v6866_v30 = vld [vmem:[#allocation8 + $0x25c] ss:$12 sps:$4 sm:$0xff]  }
 0x2c4   :  { %v4061_v49 = vmul.f32 0.01, %v4041_v46  ;;  %v4046_v50 = vadd.f32 %v4022_v42, %v3832_v18  ;;  %vm4051_vm1 = vcmp.ge.f32.partialorder %v4041_v46, 0.0  ;;  %v7041_v42 = vmov 0.0   ;;  %v6874_v47 = vld [vmem:[#allocation8 + $0x288] ss:$12 sps:$4 sm:$0xff]  }
 0x2c5   :  { %vm4055_vm2 = vcmp.ge.f32.partialorder %v4045_v3, 0.0  ;;  %v4065_v52 = vmul.f32 0.01, %v4045_v3  ;;  %v4070_v54 = vsel %vm4050_vm0, %v4040_v44, %v4060_v48  ;;  %v6871_v44 = vld [vmem:[#allocation8 + $0x274] ss:$12 sps:$4 sm:$0xff]   ;;  %v7360_v18 = vsub.s32 2, %v7337_v40 }
 0x2c6   :  { %vm4056_vm3 = vcmp.ge.f32.partialorder %v4046_v50, 0.0  ;;  %v4066_v53 = vmul.f32 0.01, %v4046_v50  ;;  %v4071_v56 = vsel %vm4051_vm1, %v4041_v46, %v4061_v49  ;;  %v6876_v46 = vld [vmem:[#allocation8 + $0x28c] ss:$12 sps:$4 sm:$0xff]  }
 0x2c7   :  { %v4075_v25 = vsel %vm4055_vm2, %v4045_v3, %v4065_v52  ;;  %v6881_v48 = vld [vmem:[#allocation8 + $0x2a4] ss:$12 sps:$4 sm:$0xff]   ;;  %v6879_v3 = vld [vmem:[#allocation8 + $0x2a0] ss:$12 sps:$4 sm:$0xff]   ;;  %v6886_v49 = vld [vmem:[#allocation8 + $0x2bc] ss:$12 sps:$4 sm:$0xff]   ;;  %v4026_v52 = vrot.slane %v7345_v11, %v7360_v18 }
 0x2c8   :  { %v4080_v55 = vpack.c.bf16 %v4075_v25, %v4070_v54  ;;  %v4076_v57 = vsel %vm4056_vm3, %v4046_v50, %v4066_v53  ;;  %v4029_v50 = vsub.s32 3, %v7337_v40  ;;  %v6884_v53 = vld [vmem:[#allocation8 + $0x2b8] ss:$12 sps:$4 sm:$0xff]   ;;  %v6891_v25 = vld [vmem:[#allocation8 + $0x2d4] ss:$12 sps:$4 sm:$0xff]  }
 0x2c9   :  { %v4081_v58 = vpack.c.bf16 %v4076_v57, %v4071_v56 }
 0x2ca   :  { %v4030_v54 = vrot.slane %v7345_v11, %v4029_v50 }
 0x2cb   :  { %4934 = vmatprep.mubr.bf16.mxu0 %v4081_v58  ;;  %5063 = vmatprep.mubr.bf16.mxu1 %v4081_v58  ;;  %v6889_v58 = vld [vmem:[#allocation8 + $0x2d0] ss:$12 sps:$4 sm:$0xff]  }
 0x2cc   :  { %4935 = vmatmul.mubr.bf16.vlgmr.msra.gmra.mrb[12].mxu0 %v4080_v55  ;;  %5064 = vmatmul.mubr.bf16.vlgmr.msra.gmra.mrb[20].mxu1 %v4080_v55 }
 0x2cd   :  { %4946 = vmatpush1.bf16.msra.mxu0 %v6835_v59  ;;  %5978 = vmatpush3.bf16.msra.mxu1 %v6863_v60 }
 0x2ce   :  { %4947 = vmatprep.subr.bf16.mxu0 %v6840_v6  ;;  %5979 = vmatprep.subr.bf16.mxu1 %v6867_v61  ;;  %v6896_v6 = vld [vmem:[#allocation8 + $0x2ec] ss:$12 sps:$4 sm:$0xff]  }
 0x2d1   :  { %4948 = vmatpush1.bf16.msra.mxu0 %v6838_v0  ;;  %5980 = vmatpush3.bf16.msra.mxu1 %v6868_v34 }
 0x2d2   :  { %4949 = vmatprep.subr.bf16.mxu0 %v6843_v1  ;;  %5981 = vmatprep.subr.bf16.mxu1 %v6872_v2 }
 0x2d5   :  { %4950 = vmatpush1.bf16.msra.mxu0 %v6841_v4  ;;  %5982 = vmatpush3.bf16.msra.mxu1 %v6873_v5  ;;  %v6894_v5 = vld [vmem:[#allocation8 + $0x2e8] ss:$12 sps:$4 sm:$0xff]  }
 0x2d6   :  { %4951 = vmatprep.subr.bf16.mxu0 %v6846_v7  ;;  %5983 = vmatprep.subr.bf16.mxu1 %v6877_v8  ;;  %v6901_v8 = vld [vmem:[#allocation8 + $0x304] ss:$12 sps:$4 sm:$0xff]  }
 0x2d9   :  { %4952 = vmatpush1.bf16.msra.mxu0 %v6844_v9  ;;  %5984 = vmatpush3.bf16.msra.mxu1 %v6878_v10 }
 0x2da   :  { %4953 = vmatprep.subr.bf16.mxu0 %v6849_v12  ;;  %5985 = vmatprep.subr.bf16.mxu1 %v6882_v14 }
 0x2dd   :  { %4954 = vmatpush1.bf16.msra.mxu0 %v6847_v16  ;;  %5986 = vmatpush3.bf16.msra.mxu1 %v6883_v28 }
 0x2de   :  { %4955 = vmatprep.subr.bf16.mxu0 %v6852_v13  ;;  %5987 = vmatprep.subr.bf16.mxu1 %v6887_v15  ;;  %v6899_v13 = vld [vmem:[#allocation8 + $0x300] ss:$12 sps:$4 sm:$0xff]   ;;  %v6902_v15 = vld [vmem:[#allocation8 + $0x308] ss:$12 sps:$4 sm:$0xff]  }
 0x2e0   :  { %v5927_v63 = vpop.f32.mrb[8].mxu0 }
 0x2e1   :  { %4956 = vmatpush1.bf16.msra.mxu0 %v6850_v17  ;;  %5988 = vmatpush3.bf16.msra.mxu1 %v6888_v22  ;;  %v5928_v26 = vpop.f32.mrb[9].mxu0  ;;  %v6905_v17 = vld [vmem:[#allocation8 + $0x31c] ss:$12 sps:$4 sm:$0xff]   ;;  %v6903_v22 = vld [vmem:[#allocation8 + $0x318] ss:$12 sps:$4 sm:$0xff]  }
 0x2e2   :  { %4957 = vmatprep.subr.bf16.mxu0 %v6855_v23  ;;  %5989 = vmatprep.subr.bf16.mxu1 %v6892_v62  ;;  %v7354_v29 = vadd.f32 %v5928_v26, %v5927_v63  ;;  %v5930_v31 = vpop.f32.mrb[10].mxu0  ;;  %v6906_v23 = vld [vmem:[#allocation8 + $0x320] ss:$12 sps:$4 sm:$0xff]   ;;  %v7042_v63 = vmov 0  }
 0x2e3   :  { %v5931_v32 = vpop.f32.mrb[11].mxu0  ;;  %v6909_v62 = vld [vmem:[#allocation8 + $0x334] ss:$12 sps:$4 sm:$0xff]   ;;  %v6913_v26 = vld [vmem:[#allocation8 + $0x34c] ss:$12 sps:$4 sm:$0xff]  }
 0x2e4   :  { %v7356_v20 = vadd.f32 %v5931_v32, %v5930_v31  ;;  %v6917_v31 = vld [vmem:[#allocation8 + $0x364] ss:$12 sps:$4 sm:$0xff]   ;;  %v6915_v32 = vld [vmem:[#allocation8 + $0x360] ss:$12 sps:$4 sm:$0xff]  }
 0x2e5   :  { %4958 = vmatpush1.bf16.msra.mxu0 %v6853_v24  ;;  %5990 = vmatpush3.bf16.msra.mxu1 %v6893_v33  ;;  %v6907_v24 = vld [vmem:[#allocation8 + $0x330] ss:$12 sps:$4 sm:$0xff]   ;;  %v6910_v33 = vld [vmem:[#allocation8 + $0x338] ss:$12 sps:$4 sm:$0xff]  }
 0x2e6   :  { %4959 = vmatprep.subr.bf16.mxu0 %v6858_v27  ;;  %5991 = vmatprep.subr.bf16.mxu1 %v6897_v51  ;;  %v6911_v27 = vld [vmem:[#allocation8 + $0x348] ss:$12 sps:$4 sm:$0xff]   ;;  %v6914_v51 = vld [vmem:[#allocation8 + $0x350] ss:$12 sps:$4 sm:$0xff]  }
 0x2e9   :  { %4960 = vmatpush1.bf16.msra.mxu0 %v6856_v21  ;;  %5992 = vmatpush3.bf16.msra.mxu1 %v6898_v35  ;;  %v6918_v21 = vld [vmem:[#allocation8 + $0x368] ss:$12 sps:$4 sm:$0xff]  }
 0x2ea   :  { %4961 = vmatprep.subr.bf16.mxu0 %v6861_v37  ;;  %6008 = vmatprep.subr.bf16.mxu1 %v7041_v42  ;;  %v6921_v35 = vld [vmem:[#allocation8 + $0x37c] ss:$12 sps:$4 sm:$0xff]   ;;  %v6919_v37 = vld [vmem:[#allocation8 + $0x378] ss:$12 sps:$4 sm:$0xff]  }
 0x2ed   :  { %4962 = vmatpush1.bf16.msra.mxu0 %v6859_v39  ;;  %v6922_v39 = vld [vmem:[#allocation8 + $0x380] ss:$12 sps:$4 sm:$0xff]  }
 0x2ee   :  { %4963 = vmatprep.subr.bf16.mxu0 %v6866_v30  ;;  %v6925_v30 = vld [vmem:[#allocation8 + $0x394] ss:$12 sps:$4 sm:$0xff]  }
 0x2f1   :  { %4964 = vmatpush1.bf16.msra.mxu0 %v6864_v43 }
 0x2f2   :  { %4965 = vmatprep.subr.bf16.mxu0 %v6871_v44  ;;  %v4033_v44 = vsub.s32 4, %v7337_v40  ;;  %v6927_v40 = vld [vmem:[#allocation8 + $0x3a8] ss:$12 sps:$4 sm:$0xff]  }
 0x2f5   :  { %4966 = vmatpush1.bf16.msra.mxu0 %v6869_v45 }
 0x2f6   :  { %4967 = vmatprep.subr.bf16.mxu0 %v6876_v46  ;;  %v6923_v46 = vld [vmem:[#allocation8 + $0x390] ss:$12 sps:$4 sm:$0xff]  }
 0x2f9   :  { %4968 = vmatpush1.bf16.msra.mxu0 %v6874_v47  ;;  %v6926_v47 = vld [vmem:[#allocation8 + $0x398] ss:$12 sps:$4 sm:$0xff]  }
 0x2fa   :  { %4969 = vmatprep.subr.bf16.mxu0 %v6881_v48 }
 0x2fd   :  { %4970 = vmatpush1.bf16.msra.mxu0 %v6879_v3 }
 0x2fe   :  { %4971 = vmatprep.subr.bf16.mxu0 %v6886_v49  ;;  %v6929_v49 = vld [vmem:[#allocation8 + $0x3ac] ss:$12 sps:$4 sm:$0xff]  }
 0x300   :  { %v3912_v55 = vpop.f32.mrb[0].mxu1 }
 0x301   :  { %v4042_v56 = vadd.f32 %v4026_v52, %v3912_v55  ;;  %v3914_v57 = vpop.f32.mrb[1].mxu1  ;;  %4972 = vmatpush1.bf16.msra.mxu0 %v6884_v53  ;;  %v4034_v53 = vrot.slane %v7345_v11, %v4033_v44 }
 0x302   :  { %v4043_v59 = vadd.f32 %v4030_v54, %v3914_v57  ;;  %v3916_v60 = vpop.f32.mrb[2].mxu1  ;;  %4973 = vmatprep.subr.bf16.mxu0 %v6891_v25  ;;  %v6930_v25 = vld [vmem:[#allocation8 + $0x3b0] ss:$12 sps:$4 sm:$0xff]  }
 0x303   :  { %v4062_v61 = vmul.f32 0.01, %v4042_v56  ;;  %v4047_v0 = vadd.f32 %v4026_v52, %v3916_v60  ;;  %v3918_v34 = vpop.f32.mrb[3].mxu1  ;;  %vm4052_vm4 = vcmp.ge.f32.partialorder %v4042_v56, 0.0 }
 0x304   :  { %v4063_v1 = vmul.f32 0.01, %v4043_v59  ;;  %v4048_v2 = vadd.f32 %v4030_v54, %v3918_v34  ;;  %vm4053_vm5 = vcmp.ge.f32.partialorder %v4043_v59, 0.0 }
 0x305   :  { %vm4057_vm6 = vcmp.ge.f32.partialorder %v4047_v0, 0.0  ;;  %v4067_v4 = vmul.f32 0.01, %v4047_v0  ;;  %4974 = vmatpush1.bf16.msra.mxu0 %v6889_v58  ;;  %v4072_v9 = vsel %vm4052_vm4, %v4042_v56, %v4062_v61 }
 0x306   :  { %vm4058_vm7 = vcmp.ge.f32.partialorder %v4048_v2, 0.0  ;;  %v4068_v7 = vmul.f32 0.01, %v4048_v2  ;;  %4975 = vmatprep.subr.bf16.mxu0 %v6896_v6  ;;  %v4073_v14 = vsel %vm4053_vm5, %v4043_v59, %v4063_v1 }
 0x307   :  { %v4077_v10 = vsel %vm4057_vm6, %v4047_v0, %v4067_v4 }
 0x308   :  { %v4082_v12 = vpack.c.bf16 %v4077_v10, %v4072_v9  ;;  %v4078_v16 = vsel %vm4058_vm7, %v4048_v2, %v4068_v7 }
 0x309   :  { %4976 = vmatpush1.bf16.msra.mxu0 %v6894_v5  ;;  %v4083_v28 = vpack.c.bf16 %v4078_v16, %v4073_v14 }
 0x30a   :  { %4988 = vmatprep.subr.bf16.mxu0 %v6901_v8 }
 0x30b   :  { %4977 = vmatprep.mubr.bf16.mxu0 %v4083_v28  ;;  %5104 = vmatprep.mubr.bf16.mxu1 %v4083_v28 }
 0x30c   :  { %4978 = vmatmul.mubr.bf16.vlgmr.msra.gmra.mrb[12].mxu0 %v4082_v12  ;;  %5105 = vmatmul.mubr.bf16.vlgmr.msra.gmra.mrb[24].mxu1 %v4082_v12 }
 0x30d   :  { %4989 = vmatpush1.bf16.msra.mxu0 %v6899_v13  ;;  %6009 = vmatpush3.bf16.msra.mxu1 %v6902_v15  ;;  %v5160_v15 = vld [vmem:[%s7406_s8] sm:$0x7] }
 0x30e   :  { %4990 = vmatprep.subr.bf16.mxu0 %v6905_v17  ;;  %6010 = vmatprep.subr.bf16.mxu1 %v7041_v42 }
 0x30f   :  { %5020 = vmatprep.mubr.bf16.mxu0 %v7042_v63  ;;  %6024 = vmatprep.mubr.msk.bf16.mxu1 %vm7043_vm8, %v7041_v42  ;;  %v5165_v63 = vrot.slane %v5160_v15, %v7340_v41 }
 0x311   :  { %4991 = vmatpush1.bf16.msra.mxu0 %v6903_v22  ;;  %6011 = vmatpush3.bf16.msra.mxu1 %v6906_v23 }
 0x312   :  { %4992 = vmatprep.subr.bf16.mxu0 %v6909_v62  ;;  %6012 = vmatprep.subr.bf16.mxu1 %v7041_v42 }
 0x315   :  { %4993 = vmatpush1.bf16.msra.mxu0 %v6907_v24  ;;  %6013 = vmatpush3.bf16.msra.mxu1 %v6910_v33 }
 0x316   :  { %4994 = vmatprep.subr.bf16.mxu0 %v6913_v26  ;;  %6014 = vmatprep.subr.bf16.mxu1 %v7041_v42 }
 0x319   :  { %4995 = vmatpush1.bf16.msra.mxu0 %v6911_v27  ;;  %6015 = vmatpush3.bf16.msra.mxu1 %v6914_v51  ;;  %v5169_v51 = vrot.slane %v5160_v15, %v7348_v19 }
 0x31a   :  { %4996 = vmatprep.subr.bf16.mxu0 %v6917_v31  ;;  %6016 = vmatprep.subr.bf16.mxu1 %v7041_v42 }
 0x31d   :  { %4997 = vmatpush1.bf16.msra.mxu0 %v6915_v32  ;;  %6017 = vmatpush3.bf16.msra.mxu1 %v6918_v21 }
 0x31e   :  { %4998 = vmatprep.subr.bf16.mxu0 %v6921_v35  ;;  %6018 = vmatprep.subr.bf16.mxu1 %v7041_v42 }
 0x320   :  { %v5949_v43 = vpop.f32.mrb[16].mxu1 }
 0x321   :  { %v5950_v45 = vpop.f32.mrb[17].mxu1  ;;  %4999 = vmatpush1.bf16.msra.mxu0 %v6919_v37  ;;  %6019 = vmatpush3.bf16.msra.mxu1 %v6922_v39 }
 0x322   :  { %v5951_v48 = vadd.f32 %v5950_v45, %v5949_v43  ;;  %v5952_v3 = vpop.f32.mrb[18].mxu1  ;;  %5000 = vmatprep.subr.bf16.mxu0 %v6925_v30  ;;  %6020 = vmatprep.subr.bf16.mxu1 %v7041_v42  ;;  %v5173_v45 = vrot.slane %v5160_v15, %v7360_v18 }
 0x323   :  { %v5953_v50 = vpop.f32.mrb[19].mxu1 }
 0x324   :  { %v3997_v52 = vadd.f32 %v5951_v48, %v7354_v29  ;;  %v5954_v54 = vadd.f32 %v5953_v50, %v5952_v3 }
 0x325   :  { %5001 = vmatpush1.bf16.msra.mxu0 %v6923_v46  ;;  %6021 = vmatpush3.bf16.msra.mxu1 %v6926_v47 }
 0x326   :  { %v4007_v55 = vadd.f32 %v3997_v52, %v7333_v36  ;;  %v4000_v56 = vadd.f32 %v5954_v54, %v7356_v20  ;;  %5002 = vmatprep.subr.bf16.mxu0 %v6929_v49  ;;  %6022 = vmatprep.subr.bf16.mxu1 %v7041_v42 }
 0x328   :  { %v4044_v57 = vadd.f32 %v4034_v53, %v4007_v55  ;;  %v4012_v58 = vadd.f32 %v4000_v56, %v7335_v38  ;;  %v4245_v38 = vld [vmem:[%s7405_s7] sm:$0x7] }
 0x329   :  { %5003 = vmatpush1.bf16.msra.mxu0 %v6927_v40  ;;  %6023 = vmatpush3.bf16.msra.mxu1 %v6930_v25  ;;  %v4258_v2 = vrot.slane %v4245_v38, %v7360_v18  ;;  %v4250_v13 = vrot.slane %v4245_v38, %v7340_v41  ;;  %v4254_v17 = vrot.slane %v4245_v38, %v7348_v19  ;;  %v5822_v56 = vld [vmem:[#allocation2] ss:$0 sm:$0xff] }
 0x32a   :  { %v4064_v29 = vmul.f32 0.01, %v4044_v57  ;;  %v4049_v59 = vadd.f32 %v4034_v53, %v4012_v58  ;;  %vm4054_vm9 = vcmp.ge.f32.partialorder %v4044_v57, 0.0 }
 0x32c   :  { %v4069_v11 = vmul.f32 0.01, %v4049_v59  ;;  %vm4059_vm10 = vcmp.ge.f32.partialorder %v4049_v59, 0.0  ;;  %v4074_v60 = vsel %vm4054_vm9, %v4044_v57, %v4064_v29 }
 0x32e   :  { %v4079_v6 = vsel %vm4059_vm10, %v4049_v59, %v4069_v11 }
 0x32f   :  { %v4084_v61 = vpack.c.bf16 %v4079_v6, %v4074_v60 }
 0x331   :  { %5021 = vmatmul.mubr.bf16.vlgmr.msra.gmra.mrb[12].mxu0 %v4084_v61  ;;  %6025 = vmatmul.mubr.bf16.vlgmr.msra.gmra.mrb[28].mxu1 %v4084_v61 }
 0x39f   :  { %v5971_v36 = vpop.f32.mrb[20].mxu1 }
 0x3a0   :  { %v5972_v20 = vpop.f32.mrb[21].mxu1 }
 0x3a1   :  { %v5973_v0 = vadd.f32 %v5972_v20, %v5971_v36  ;;  %v5974_v34 = vpop.f32.mrb[22].mxu1 }
 0x3a2   :  { %v5975_v42 = vpop.f32.mrb[23].mxu1 }
 0x3a3   :  { %v5976_v1 = vadd.f32 %v5975_v42, %v5974_v34  ;;  %v5066_v7 = vadd.f32 %v5973_v0, %v4258_v2 }
 0x3a5   :  { %v5069_v12 = vadd.f32 %v5976_v1, %v4258_v2 }
 0x3df   :  { %v5993_v4 = vpop.f32.mrb[24].mxu1 }
 0x3e0   :  { %v5994_v5 = vpop.f32.mrb[25].mxu1 }
 0x3e1   :  { %v5995_v8 = vadd.f32 %v5994_v5, %v5993_v4  ;;  %v5996_v9 = vpop.f32.mrb[26].mxu1 }
 0x3e2   :  { %v5997_v10 = vpop.f32.mrb[27].mxu1 }
 0x3e3   :  { %v5998_v14 = vadd.f32 %v5997_v10, %v5996_v9  ;;  %v5107_v16 = vadd.f32 %v5995_v8, %v5066_v7 }
 0x3e5   :  { %v5110_v28 = vadd.f32 %v5998_v14, %v5069_v12 }
 0x404   :  { %v5022_v22 = vpop.f32.mrb[12].mxu0  ;;  %v5147_v23 = vpop.f32.mrb[28].mxu1 }
 0x405   :  { %v6028_v62 = vadd.f32 %v5022_v22, %v4250_v13  ;;  %v5148_v24 = vadd.f32 %v5147_v23, %v5107_v16  ;;  %v5024_v33 = vpop.f32.mrb[13].mxu0  ;;  %v6026_v26 = vpop.f32.mrb[29].mxu1 }
 0x406   :  { %v6029_v27 = vadd.f32 %v5024_v33, %v4254_v17  ;;  %v5026_v31 = vpop.f32.mrb[14].mxu0  ;;  %v5150_v32 = vpop.f32.mrb[30].mxu1 }
 0x407   :  { %v5154_v21 = vmax.f32 %v6028_v62, 0.0  ;;  %v6030_v35 = vadd.f32 %v5026_v31, %v4250_v13  ;;  %v5151_v37 = vadd.f32 %v5150_v32, %v5110_v28  ;;  %v5028_v39 = vpop.f32.mrb[15].mxu0  ;;  %v6027_v30 = vpop.f32.mrb[31].mxu1  ;;  %v5156_v43 = vmax.f32 %v5148_v24, 0.0 }
 0x408   :  { %v5155_v44 = vmax.f32 %v6029_v27, 0.0  ;;  %v6031_v46 = vadd.f32 %v5028_v39, %v4254_v17 }
 0x409   :  { %v5177_v47 = vmul.f32 %v5165_v63, %v5154_v21  ;;  %v5157_v41 = vmax.f32 %v6030_v35, 0.0  ;;  %v5159_v3 = vmax.f32 %v5151_v37, 0.0  ;;  %v5179_v19 = vmul.f32 %v5173_v45, %v5156_v43 }
 0x40a   :  { %v5178_v48 = vmul.f32 %v5169_v51, %v5155_v44  ;;  %v5158_v49 = vmax.f32 %v6031_v46, 0.0 }
 0x40b   :  { %v5180_v50 = vmul.f32 %v5165_v63, %v5157_v41  ;;  %v5182_v54 = vmul.f32 %v5173_v45, %v5159_v3 }
 0x40c   :  { %v5181_v52 = vmul.f32 %v5169_v51, %v5158_v49  ;;  %v5183_v53 = vadd.f32 %v5178_v48, %v5177_v47 }
 0x40e   :  { %v5184_v40 = vadd.f32 %v5183_v53, %v5179_v19  ;;  %v5187_v25 = vadd.f32 %v5181_v52, %v5180_v50 }
 0x410   :  { %5185 = vadd.xlane.f32.xlu0 %v5184_v40  ;;  %v5188_v55 = vadd.f32 %v5187_v25, %v5182_v54 }
 0x414   :  { %5189 = vadd.xlane.f32.xlu0 %v5188_v55 }
 0x49d   :  { %v5186_v57 = vpop.xlane.xlu0 %5185 }
 0x49e   :  { %v5198_v18 = vadd.f32 %v5822_v56, %v5186_v57 }
 0x4a0   :  { %5201 = vst.msk [vmem:[%s7408_s10] sm:$0xff] %vm5200_vm11, %v5198_v18 }
 0x4a1   :  { %v5190_v58 = vpop.xlane.xlu0 %5189 }
 0x4a2   :  { %v5199_v29 = vadd.f32 %v5822_v56, %v5190_v58 }
 0x4a4   :  { %5202 = vst.msk [vmem:[%s7408_s10 + $0x8] sm:$0xff] %vm5200_vm11, %v5199_v29 }
 0x4a5   :  { %5207 = vsyncpa [#allocation4], 1 }
 0x4a6   :  { %5208 = vsyncpa [#allocation6], 1 }
 0x4a7   :  { %5209 = vsyncpa [#allocation9], 1 }

</bundles_post_ra>
